<compile_context>
chip_gen: v7x
topology: tpu7x:2x2x1
jax: 0.10.0
libtpu: 0.0.40
codegen_flags: <defaults>
</compile_context>

<pallas_src>
import functools

import jax
import jax.numpy as jnp
from jax import lax
from jax.experimental import pallas as pl
from jax.experimental.pallas import tpu as pltpu

SEQ = 8                      # tokens
EMBED = 32                   # logical embedding width
NUM_HEADS = 4
HEAD_DIM = EMBED // NUM_HEADS
FF_DIM = 4 * EMBED           # 128 -> already lane dense
NUM_LAYERS = 2
EMBED_PAD = 128              # lane-dense padded embedding width
LN_EPS = 1e-5
NEG_INF = -1e9


# --------------------------------------------------------------------------
# Fused kernel: one grid step == one decoder layer.
# --------------------------------------------------------------------------
def _fused_decoder_kernel(
    mask_ref, x_ref,
    wq_ref, wk_ref, wv_ref, bq_ref, bk_ref, bv_ref, wo_ref, bo_ref,
    g1_ref, be1_ref, w1_ref, b1_ref, w2_ref, b2_ref, g2_ref, be2_ref,
    o_ref,
    q_s, k_s, v_s, ctx_s,
    *, num_heads, head_dim, e_real,
):
    # Layer 0: load the input activation into the resident output block.
    @pl.when(pl.program_id(0) == 0)
    def _():
        o_ref[...] = x_ref[...]

    x = o_ref[...]                                   # [S, EP] (pad cols == 0)

    # ---- QKV projections into head-major [H, S, Dh] scratch ---------------
    # Leading-axis indexing of [H, EP, Dh] weights avoids lane-unaligned
    # slices; contraction dim is the lane-dense padded EMBED (128).
    for h in range(num_heads):
        q_s[h] = jnp.dot(x, wq_ref[h], preferred_element_type=jnp.float32) + bq_ref[h]
        k_s[h] = jnp.dot(x, wk_ref[h], preferred_element_type=jnp.float32) + bk_ref[h]
        v_s[h] = jnp.dot(x, wv_ref[h], preferred_element_type=jnp.float32) + bv_ref[h]

    # ---- causal attention, all heads batched -------------------------------
    scale = 1.0 / (head_dim ** 0.5)
    s = jnp.einsum('hqd,hkd->hqk', q_s[...], k_s[...],
                   preferred_element_type=jnp.float32) * scale
    s = s + mask_ref[...]                            # hoisted additive causal mask
    m = jnp.max(s, axis=-1, keepdims=True)
    p = jnp.exp(s - m)
    denom = jnp.sum(p, axis=-1, keepdims=True)
    p = p * pl.reciprocal(denom, approx=True)        # EUP vrcp (free slot)
    ctx_s[...] = jnp.einsum('hqk,hkd->hqd', p, v_s[...],
                            preferred_element_type=jnp.float32)

    # ---- output projection: per-head accumulation (folds away the concat) --
    attn = bo_ref[...]                               # [1, EP], broadcasts
    for h in range(num_heads):
        attn = attn + jnp.dot(ctx_s[h], wo_ref[h], preferred_element_type=jnp.float32)

    # ---- residual + LayerNorm 1 (stats over the real EMBED columns) --------
    h1 = x + attn
    mu = jnp.sum(h1, axis=-1, keepdims=True) / e_real
    var = jnp.sum(h1 * h1, axis=-1, keepdims=True) / e_real - mu * mu
    h1 = (h1 - mu) * lax.rsqrt(var + LN_EPS) * g1_ref[...] + be1_ref[...]

    # ---- feed-forward -------------------------------------------------------
    ff = jnp.dot(h1, w1_ref[...], preferred_element_type=jnp.float32) + b1_ref[...]
    ff = jnp.maximum(ff, 0.0)
    ff = jnp.dot(ff, w2_ref[...], preferred_element_type=jnp.float32) + b2_ref[...]

    # ---- residual + LayerNorm 2 ---------------------------------------------
    h2 = h1 + ff
    mu2 = jnp.sum(h2, axis=-1, keepdims=True) / e_real
    var2 = jnp.sum(h2 * h2, axis=-1, keepdims=True) / e_real - mu2 * mu2
    out = (h2 - mu2) * lax.rsqrt(var2 + LN_EPS) * g2_ref[...] + be2_ref[...]

    o_ref[...] = out                                 # stays resident for next layer


# --------------------------------------------------------------------------
# Wrapper: single pallas_call over the layer grid.
# --------------------------------------------------------------------------
def decoder_only_transformer(x, packed_params):
    S = x.shape[0]
    x_pad = jnp.pad(x, ((0, 0), (0, EMBED_PAD - EMBED)))

    # Additive causal mask, built once (hoisted out of the layer loop).
    row = lax.broadcasted_iota(jnp.int32, (S, S), 0)
    col = lax.broadcasted_iota(jnp.int32, (S, S), 1)
    mask = jnp.where(col <= row, 0.0, NEG_INF).astype(jnp.float32)

    kernel = functools.partial(
        _fused_decoder_kernel,
        num_heads=NUM_HEADS, head_dim=HEAD_DIM, e_real=float(EMBED),
    )

    def fixed(shape):
        # Whole-array block with a constant index_map -> stays VMEM-resident.
        return pl.BlockSpec(shape, lambda l, _s=shape: (0,) * len(_s))

    def per_layer(shape):
        # Stacked [L, ...] weights: one layer slice per grid step (prefetched).
        return pl.BlockSpec((None,) + shape, lambda l, _s=shape: (l,) + (0,) * len(_s))

    grid_spec = pltpu.PrefetchScalarGridSpec(
        num_scalar_prefetch=0,
        grid=(NUM_LAYERS,),
        in_specs=[
            fixed((S, S)),                                  # mask
            fixed((S, EMBED_PAD)),                          # x
            per_layer((NUM_HEADS, EMBED_PAD, HEAD_DIM)),    # wq
            per_layer((NUM_HEADS, EMBED_PAD, HEAD_DIM)),    # wk
            per_layer((NUM_HEADS, EMBED_PAD, HEAD_DIM)),    # wv
            per_layer((NUM_HEADS, 1, HEAD_DIM)),            # bq
            per_layer((NUM_HEADS, 1, HEAD_DIM)),            # bk
            per_layer((NUM_HEADS, 1, HEAD_DIM)),            # bv
            per_layer((NUM_HEADS, HEAD_DIM, EMBED_PAD)),    # wo
            per_layer((1, EMBED_PAD)),                      # bo
            per_layer((1, EMBED_PAD)),                      # ln1 gamma
            per_layer((1, EMBED_PAD)),                      # ln1 beta
            per_layer((EMBED_PAD, FF_DIM)),                 # w1
            per_layer((1, FF_DIM)),                         # b1
            per_layer((FF_DIM, EMBED_PAD)),                 # w2
            per_layer((1, EMBED_PAD)),                      # b2
            per_layer((1, EMBED_PAD)),                      # ln2 gamma
            per_layer((1, EMBED_PAD)),                      # ln2 beta
        ],
        out_specs=fixed((S, EMBED_PAD)),
        scratch_shapes=[
            pltpu.VMEM((NUM_HEADS, S, HEAD_DIM), jnp.float32),   # q
            pltpu.VMEM((NUM_HEADS, S, HEAD_DIM), jnp.float32),   # k
            pltpu.VMEM((NUM_HEADS, S, HEAD_DIM), jnp.float32),   # v
            pltpu.VMEM((NUM_HEADS, S, HEAD_DIM), jnp.float32),   # ctx
        ],
    )

    out_pad = pl.pallas_call(
        kernel,
        out_shape=jax.ShapeDtypeStruct((S, EMBED_PAD), jnp.float32),
        grid_spec=grid_spec,
        compiler_params=pltpu.CompilerParams(
            dimension_semantics=("arbitrary",),   # layers are sequential
        ),
    )(mask, x_pad, *packed_params)

    return out_pad[:, :EMBED]


# --------------------------------------------------------------------------
# Parameter handling.
# --------------------------------------------------------------------------
def init_params(key, num_layers):
    """Logical per-layer params ([in, out] weight layout)."""
    params = []
    for _ in range(num_layers):
        key, *ks = jax.random.split(key, 17)

        def w(k, shape, scale=0.1):
            return (scale * jax.random.normal(k, shape)).astype(jnp.float32)

        wq = w(ks[0], (EMBED, EMBED)); bq = w(ks[1], (EMBED,), 0.02)
        wk = w(ks[2], (EMBED, EMBED)); bk = w(ks[3], (EMBED,), 0.02)
        wv = w(ks[4], (EMBED, EMBED)); bv = w(ks[5], (EMBED,), 0.02)
        wo = w(ks[6], (EMBED, EMBED)); bo = w(ks[7], (EMBED,), 0.02)
        w1 = w(ks[8], (EMBED, FF_DIM)); b1 = w(ks[9], (FF_DIM,), 0.02)
        w2 = w(ks[10], (FF_DIM, EMBED)); b2 = w(ks[11], (EMBED,), 0.02)
        g1 = 1.0 + w(ks[12], (EMBED,), 0.02); be1 = w(ks[13], (EMBED,), 0.02)
        g2 = 1.0 + w(ks[14], (EMBED,), 0.02); be2 = w(ks[15], (EMBED,), 0.02)
        params.append((wq, bq, wk, bk, wv, bv, wo, bo,
                       g1, be1, w1, b1, w2, b2, g2, be2))
    return params


def pack_params(params):
    """Stack per-layer params along a layer axis, head-major QKV/O, pad E->128."""
    def pad_axis(a, axis, target):
        pads = [(0, 0)] * a.ndim
        pads[axis] = (0, target - a.shape[axis])
        return jnp.pad(a, pads)

    names = ("wq", "wk", "wv", "bq", "bk", "bv", "wo", "bo",
             "g1", "be1", "w1", "b1", "w2", "b2", "g2", "be2")
    acc = {n: [] for n in names}

    for (wq, bq, wk, bk, wv, bv, wo, bo, g1, be1, w1, b1, w2, b2, g2, be2) in params:
        def qkv_w(w_):   # [E, E] -> [H, E_pad, Dh]
            w_ = w_.reshape(EMBED, NUM_HEADS, HEAD_DIM).transpose(1, 0, 2)
            return pad_axis(w_, 1, EMBED_PAD)

        def qkv_b(b_):   # [E] -> [H, 1, Dh]
            return b_.reshape(NUM_HEADS, 1, HEAD_DIM)

        def row_pad(v):  # [E] -> [1, E_pad]
            return pad_axis(v.reshape(1, EMBED), 1, EMBED_PAD)

        acc["wq"].append(qkv_w(wq)); acc["wk"].append(qkv_w(wk)); acc["wv"].append(qkv_w(wv))
        acc["bq"].append(qkv_b(bq)); acc["bk"].append(qkv_b(bk)); acc["bv"].append(qkv_b(bv))
        acc["wo"].append(pad_axis(wo.reshape(NUM_HEADS, HEAD_DIM, EMBED), 2, EMBED_PAD))
        acc["bo"].append(row_pad(bo))
        acc["g1"].append(row_pad(g1)); acc["be1"].append(row_pad(be1))
        acc["w1"].append(pad_axis(w1, 0, EMBED_PAD))      # [E_pad, FF]
        acc["b1"].append(b1.reshape(1, FF_DIM))
        acc["w2"].append(pad_axis(w2, 1, EMBED_PAD))      # [FF, E_pad]
        acc["b2"].append(row_pad(b2))
        acc["g2"].append(row_pad(g2)); acc["be2"].append(row_pad(be2))

    return tuple(jnp.stack(acc[n], axis=0) for n in names)


# --------------------------------------------------------------------------
# Pure-JAX reference (unpadded) for correctness verification.
# --------------------------------------------------------------------------
def reference_forward(x, params):
    for (wq, bq, wk, bk, wv, bv, wo, bo, g1, be1, w1, b1, w2, b2, g2, be2) in params:
        S = x.shape[0]
        q = x @ wq + bq
        k = x @ wk + bk
        v = x @ wv + bv
        qh = q.reshape(S, NUM_HEADS, HEAD_DIM).transpose(1, 0, 2)
        kh = k.reshape(S, NUM_HEADS, HEAD_DIM).transpose(1, 0, 2)
        vh = v.reshape(S, NUM_HEADS, HEAD_DIM).transpose(1, 0, 2)
        s = jnp.einsum('hqd,hkd->hqk', qh, kh) / jnp.sqrt(float(HEAD_DIM))
        causal = jnp.tril(jnp.ones((S, S), bool))
        s = jnp.where(causal, s, NEG_INF)
        p = jax.nn.softmax(s, axis=-1)
        ctx = jnp.einsum('hqk,hkd->hqd', p, vh).transpose(1, 0, 2).reshape(S, EMBED)
        attn = ctx @ wo + bo
        h1 = x + attn
        h1 = (h1 - h1.mean(-1, keepdims=True)) * jax.lax.rsqrt(
            h1.var(-1, keepdims=True) + LN_EPS) * g1 + be1
        ff = jnp.maximum(h1 @ w1 + b1, 0.0) @ w2 + b2
        h2 = h1 + ff
        x = (h2 - h2.mean(-1, keepdims=True)) * jax.lax.rsqrt(
            h2.var(-1, keepdims=True) + LN_EPS) * g2 + be2
    return x


if __name__ == "__main__":
    key = jax.random.PRNGKey(0)
    k_x, k_p = jax.random.split(key)

    # Reference feeds a single [1, embed_dim] token row; we use a small
    # sequence of 8 tokens with embed_dim=32 (TPU-friendly small shapes).
    x = jax.random.normal(k_x, (SEQ, EMBED), dtype=jnp.float32)
    params = init_params(k_p, NUM_LAYERS)
    packed = pack_params(params)

    fwd = jax.jit(decoder_only_transformer)
    out = jax.block_until_ready(fwd(x, packed))

    assert out.shape == (SEQ, EMBED) and out.dtype == jnp.float32
    ref = reference_forward(x, params)
    max_err = float(jnp.max(jnp.abs(out - ref)))
    assert jnp.allclose(out, ref, atol=5e-2, rtol=5e-2), max_err
    print("KERNEL_OK")
</pallas_src>

<mosaic_0001>
module attributes {stable_mosaic.version = 11 : i64} {
  func.func @_fused_decoder_kernel(%arg0: i32, %arg1: memref<8x8xf32, #tpu.memory_space<vmem>>, %arg2: memref<8x128xf32, #tpu.memory_space<vmem>>, %arg3: memref<1x4x128x8xf32, #tpu.memory_space<vmem>>, %arg4: memref<1x4x128x8xf32, #tpu.memory_space<vmem>>, %arg5: memref<1x4x128x8xf32, #tpu.memory_space<vmem>>, %arg6: memref<1x4x1x8xf32, #tpu.memory_space<vmem>>, %arg7: memref<1x4x1x8xf32, #tpu.memory_space<vmem>>, %arg8: memref<1x4x1x8xf32, #tpu.memory_space<vmem>>, %arg9: memref<1x4x8x128xf32, #tpu.memory_space<vmem>>, %arg10: memref<1x1x128xf32, #tpu.memory_space<vmem>>, %arg11: memref<1x1x128xf32, #tpu.memory_space<vmem>>, %arg12: memref<1x1x128xf32, #tpu.memory_space<vmem>>, %arg13: memref<1x128x128xf32, #tpu.memory_space<vmem>>, %arg14: memref<1x1x128xf32, #tpu.memory_space<vmem>>, %arg15: memref<1x128x128xf32, #tpu.memory_space<vmem>>, %arg16: memref<1x1x128xf32, #tpu.memory_space<vmem>>, %arg17: memref<1x1x128xf32, #tpu.memory_space<vmem>>, %arg18: memref<1x1x128xf32, #tpu.memory_space<vmem>>, %arg19: memref<8x128xf32, #tpu.memory_space<vmem>>, %arg20: memref<4x8x8xf32, #tpu.memory_space<vmem>>, %arg21: memref<4x8x8xf32, #tpu.memory_space<vmem>>, %arg22: memref<4x8x8xf32, #tpu.memory_space<vmem>>, %arg23: memref<4x8x8xf32, #tpu.memory_space<vmem>>) attributes {dimension_semantics = [#tpu.dimension_semantics<arbitrary>], iteration_bounds = array<i64: 2>, scalar_prefetch = 0 : i64, scratch_operands = 4 : i64, tpu.core_type = #tpu.core_type<tc>, window_params = [{pipeline_mode = #tpu.pipeline_mode<synchronous>, transform_indices = @transform_0, window_bounds = array<i64: 8, 8>}, {pipeline_mode = #tpu.pipeline_mode<synchronous>, transform_indices = @transform_1, window_bounds = array<i64: 8, 128>}, {transform_indices = @transform_2, window_bounds = array<i64: 1, 4, 128, 8>}, {transform_indices = @transform_3, window_bounds = array<i64: 1, 4, 128, 8>}, {transform_indices = @transform_4, window_bounds = array<i64: 1, 4, 128, 8>}, {transform_indices = @transform_5, window_bounds = array<i64: 1, 4, 1, 8>}, {transform_indices = @transform_6, window_bounds = array<i64: 1, 4, 1, 8>}, {transform_indices = @transform_7, window_bounds = array<i64: 1, 4, 1, 8>}, {transform_indices = @transform_8, window_bounds = array<i64: 1, 4, 8, 128>}, {transform_indices = @transform_9, window_bounds = array<i64: 1, 1, 128>}, {transform_indices = @transform_10, window_bounds = array<i64: 1, 1, 128>}, {transform_indices = @transform_11, window_bounds = array<i64: 1, 1, 128>}, {transform_indices = @transform_12, window_bounds = array<i64: 1, 128, 128>}, {transform_indices = @transform_13, window_bounds = array<i64: 1, 1, 128>}, {transform_indices = @transform_14, window_bounds = array<i64: 1, 128, 128>}, {transform_indices = @transform_15, window_bounds = array<i64: 1, 1, 128>}, {transform_indices = @transform_16, window_bounds = array<i64: 1, 1, 128>}, {transform_indices = @transform_17, window_bounds = array<i64: 1, 1, 128>}, {pipeline_mode = #tpu.pipeline_mode<synchronous>, transform_indices = @transform_18, window_bounds = array<i64: 8, 128>}]} {
    %c0_i32 = arith.constant 0 : i32
    %0 = arith.cmpi eq, %arg0, %c0_i32 : i32
    %1 = arith.extui %0 : i1 to i32
    %c0_i32_0 = arith.constant 0 : i32
    %2 = arith.cmpi ne, %1, %c0_i32_0 : i32
    scf.if %2 {
      %c0_235 = arith.constant 0 : index
      %c0_236 = arith.constant 0 : index
      %244 = vector.load %arg2[%c0_235, %c0_236] : memref<8x128xf32, #tpu.memory_space<vmem>>, vector<8x128xf32>
      %c0_237 = arith.constant 0 : index
      %c0_238 = arith.constant 0 : index
      %245 = vector.load %arg19[%c0_237, %c0_238] : memref<8x128xf32, #tpu.memory_space<vmem>>, vector<8x128xf32>
      tpu.vector_store %arg19[%c0_237, %c0_238], %244 {strides = array<i32>} : memref<8x128xf32, #tpu.memory_space<vmem>>, vector<8x128xf32>,
    } else {
    }
    %c0 = arith.constant 0 : index
    %c0_1 = arith.constant 0 : index
    %3 = vector.load %arg19[%c0, %c0_1] : memref<8x128xf32, #tpu.memory_space<vmem>>, vector<8x128xf32>
    %c0_2 = arith.constant 0 : index
    %c0_3 = arith.constant 0 : index
    %c0_4 = arith.constant 0 : index
    %c0_5 = arith.constant 0 : index
    %4 = vector.load %arg3[%c0_2, %c0_3, %c0_4, %c0_5] : memref<1x4x128x8xf32, #tpu.memory_space<vmem>>, vector<1x1x128x8xf32>
    %5 = vector.shape_cast %4 : vector<1x1x128x8xf32> to vector<128x8xf32>
    %cst = arith.constant dense<0.000000e+00> : vector<8x8xf32>
    %6 = tpu.matmul %3, %5, %cst {dimension_numbers = #tpu.dot_dimension_numbers<[1], [0], [0], [1], [0, 0, 1, 1], [], []>} : vector<8x128xf32>, vector<128x8xf32>, vector<8x8xf32> -> vector<8x8xf32>
    %c0_6 = arith.constant 0 : index
    %c0_7 = arith.constant 0 : index
    %c0_8 = arith.constant 0 : index
    %c0_9 = arith.constant 0 : index
    %7 = vector.load %arg6[%c0_6, %c0_7, %c0_8, %c0_9] : memref<1x4x1x8xf32, #tpu.memory_space<vmem>>, vector<1x1x1x8xf32>
    %8 = vector.shape_cast %7 : vector<1x1x1x8xf32> to vector<1x8xf32>
    %9 = vector.broadcast %8 : vector<1x8xf32> to vector<8x8xf32>
    %10 = arith.addf %6, %9 : vector<8x8xf32>
    %c0_10 = arith.constant 0 : index
    %c0_11 = arith.constant 0 : index
    %c0_12 = arith.constant 0 : index
    %11 = vector.load %arg20[%c0_10, %c0_11, %c0_12] : memref<4x8x8xf32, #tpu.memory_space<vmem>>, vector<1x8x8xf32>
    %12 = vector.shape_cast %11 : vector<1x8x8xf32> to vector<8x8xf32>
    %13 = vector.shape_cast %10 : vector<8x8xf32> to vector<1x8x8xf32>
    tpu.vector_store %arg20[%c0_10, %c0_11, %c0_12], %13 {strides = array<i32>} : memref<4x8x8xf32, #tpu.memory_space<vmem>>, vector<1x8x8xf32>,
    %c0_13 = arith.constant 0 : index
    %c0_14 = arith.constant 0 : index
    %c0_15 = arith.constant 0 : index
    %c0_16 = arith.constant 0 : index
    %14 = vector.load %arg4[%c0_13, %c0_14, %c0_15, %c0_16] : memref<1x4x128x8xf32, #tpu.memory_space<vmem>>, vector<1x1x128x8xf32>
    %15 = vector.shape_cast %14 : vector<1x1x128x8xf32> to vector<128x8xf32>
    %cst_17 = arith.constant dense<0.000000e+00> : vector<8x8xf32>
    %16 = tpu.matmul %3, %15, %cst_17 {dimension_numbers = #tpu.dot_dimension_numbers<[1], [0], [0], [1], [0, 0, 1, 1], [], []>} : vector<8x128xf32>, vector<128x8xf32>, vector<8x8xf32> -> vector<8x8xf32>
    %c0_18 = arith.constant 0 : index
    %c0_19 = arith.constant 0 : index
    %c0_20 = arith.constant 0 : index
    %c0_21 = arith.constant 0 : index
    %17 = vector.load %arg7[%c0_18, %c0_19, %c0_20, %c0_21] : memref<1x4x1x8xf32, #tpu.memory_space<vmem>>, vector<1x1x1x8xf32>
    %18 = vector.shape_cast %17 : vector<1x1x1x8xf32> to vector<1x8xf32>
    %19 = vector.broadcast %18 : vector<1x8xf32> to vector<8x8xf32>
    %20 = arith.addf %16, %19 : vector<8x8xf32>
    %c0_22 = arith.constant 0 : index
    %c0_23 = arith.constant 0 : index
    %c0_24 = arith.constant 0 : index
    %21 = vector.load %arg21[%c0_22, %c0_23, %c0_24] : memref<4x8x8xf32, #tpu.memory_space<vmem>>, vector<1x8x8xf32>
    %22 = vector.shape_cast %21 : vector<1x8x8xf32> to vector<8x8xf32>
    %23 = vector.shape_cast %20 : vector<8x8xf32> to vector<1x8x8xf32>
    tpu.vector_store %arg21[%c0_22, %c0_23, %c0_24], %23 {strides = array<i32>} : memref<4x8x8xf32, #tpu.memory_space<vmem>>, vector<1x8x8xf32>,
    %c0_25 = arith.constant 0 : index
    %c0_26 = arith.constant 0 : index
    %c0_27 = arith.constant 0 : index
    %c0_28 = arith.constant 0 : index
    %24 = vector.load %arg5[%c0_25, %c0_26, %c0_27, %c0_28] : memref<1x4x128x8xf32, #tpu.memory_space<vmem>>, vector<1x1x128x8xf32>
    %25 = vector.shape_cast %24 : vector<1x1x128x8xf32> to vector<128x8xf32>
    %cst_29 = arith.constant dense<0.000000e+00> : vector<8x8xf32>
    %26 = tpu.matmul %3, %25, %cst_29 {dimension_numbers = #tpu.dot_dimension_numbers<[1], [0], [0], [1], [0, 0, 1, 1], [], []>} : vector<8x128xf32>, vector<128x8xf32>, vector<8x8xf32> -> vector<8x8xf32>
    %c0_30 = arith.constant 0 : index
    %c0_31 = arith.constant 0 : index
    %c0_32 = arith.constant 0 : index
    %c0_33 = arith.constant 0 : index
    %27 = vector.load %arg8[%c0_30, %c0_31, %c0_32, %c0_33] : memref<1x4x1x8xf32, #tpu.memory_space<vmem>>, vector<1x1x1x8xf32>
    %28 = vector.shape_cast %27 : vector<1x1x1x8xf32> to vector<1x8xf32>
    %29 = vector.broadcast %28 : vector<1x8xf32> to vector<8x8xf32>
    %30 = arith.addf %26, %29 : vector<8x8xf32>
    %c0_34 = arith.constant 0 : index
    %c0_35 = arith.constant 0 : index
    %c0_36 = arith.constant 0 : index
    %31 = vector.load %arg22[%c0_34, %c0_35, %c0_36] : memref<4x8x8xf32, #tpu.memory_space<vmem>>, vector<1x8x8xf32>
    %32 = vector.shape_cast %31 : vector<1x8x8xf32> to vector<8x8xf32>
    %33 = vector.shape_cast %30 : vector<8x8xf32> to vector<1x8x8xf32>
    tpu.vector_store %arg22[%c0_34, %c0_35, %c0_36], %33 {strides = array<i32>} : memref<4x8x8xf32, #tpu.memory_space<vmem>>, vector<1x8x8xf32>,
    %c0_37 = arith.constant 0 : index
    %c1 = arith.constant 1 : index
    %c0_38 = arith.constant 0 : index
    %c0_39 = arith.constant 0 : index
    %34 = vector.load %arg3[%c0_37, %c1, %c0_38, %c0_39] : memref<1x4x128x8xf32, #tpu.memory_space<vmem>>, vector<1x1x128x8xf32>
    %35 = vector.shape_cast %34 : vector<1x1x128x8xf32> to vector<128x8xf32>
    %cst_40 = arith.constant dense<0.000000e+00> : vector<8x8xf32>
    %36 = tpu.matmul %3, %35, %cst_40 {dimension_numbers = #tpu.dot_dimension_numbers<[1], [0], [0], [1], [0, 0, 1, 1], [], []>} : vector<8x128xf32>, vector<128x8xf32>, vector<8x8xf32> -> vector<8x8xf32>
    %c0_41 = arith.constant 0 : index
    %c1_42 = arith.constant 1 : index
    %c0_43 = arith.constant 0 : index
    %c0_44 = arith.constant 0 : index
    %37 = vector.load %arg6[%c0_41, %c1_42, %c0_43, %c0_44] : memref<1x4x1x8xf32, #tpu.memory_space<vmem>>, vector<1x1x1x8xf32>
    %38 = vector.shape_cast %37 : vector<1x1x1x8xf32> to vector<1x8xf32>
    %39 = vector.broadcast %38 : vector<1x8xf32> to vector<8x8xf32>
    %40 = arith.addf %36, %39 : vector<8x8xf32>
    %c1_45 = arith.constant 1 : index
    %c0_46 = arith.constant 0 : index
    %c0_47 = arith.constant 0 : index
    %41 = vector.load %arg20[%c1_45, %c0_46, %c0_47] : memref<4x8x8xf32, #tpu.memory_space<vmem>>, vector<1x8x8xf32>
    %42 = vector.shape_cast %41 : vector<1x8x8xf32> to vector<8x8xf32>
    %43 = vector.shape_cast %40 : vector<8x8xf32> to vector<1x8x8xf32>
    tpu.vector_store %arg20[%c1_45, %c0_46, %c0_47], %43 {strides = array<i32>} : memref<4x8x8xf32, #tpu.memory_space<vmem>>, vector<1x8x8xf32>,
    %c0_48 = arith.constant 0 : index
    %c1_49 = arith.constant 1 : index
    %c0_50 = arith.constant 0 : index
    %c0_51 = arith.constant 0 : index
    %44 = vector.load %arg4[%c0_48, %c1_49, %c0_50, %c0_51] : memref<1x4x128x8xf32, #tpu.memory_space<vmem>>, vector<1x1x128x8xf32>
    %45 = vector.shape_cast %44 : vector<1x1x128x8xf32> to vector<128x8xf32>
    %cst_52 = arith.constant dense<0.000000e+00> : vector<8x8xf32>
    %46 = tpu.matmul %3, %45, %cst_52 {dimension_numbers = #tpu.dot_dimension_numbers<[1], [0], [0], [1], [0, 0, 1, 1], [], []>} : vector<8x128xf32>, vector<128x8xf32>, vector<8x8xf32> -> vector<8x8xf32>
    %c0_53 = arith.constant 0 : index
    %c1_54 = arith.constant 1 : index
    %c0_55 = arith.constant 0 : index
    %c0_56 = arith.constant 0 : index
    %47 = vector.load %arg7[%c0_53, %c1_54, %c0_55, %c0_56] : memref<1x4x1x8xf32, #tpu.memory_space<vmem>>, vector<1x1x1x8xf32>
    %48 = vector.shape_cast %47 : vector<1x1x1x8xf32> to vector<1x8xf32>
    %49 = vector.broadcast %48 : vector<1x8xf32> to vector<8x8xf32>
    %50 = arith.addf %46, %49 : vector<8x8xf32>
    %c1_57 = arith.constant 1 : index
    %c0_58 = arith.constant 0 : index
    %c0_59 = arith.constant 0 : index
    %51 = vector.load %arg21[%c1_57, %c0_58, %c0_59] : memref<4x8x8xf32, #tpu.memory_space<vmem>>, vector<1x8x8xf32>
    %52 = vector.shape_cast %51 : vector<1x8x8xf32> to vector<8x8xf32>
    %53 = vector.shape_cast %50 : vector<8x8xf32> to vector<1x8x8xf32>
    tpu.vector_store %arg21[%c1_57, %c0_58, %c0_59], %53 {strides = array<i32>} : memref<4x8x8xf32, #tpu.memory_space<vmem>>, vector<1x8x8xf32>,
    %c0_60 = arith.constant 0 : index
    %c1_61 = arith.constant 1 : index
    %c0_62 = arith.constant 0 : index
    %c0_63 = arith.constant 0 : index
    %54 = vector.load %arg5[%c0_60, %c1_61, %c0_62, %c0_63] : memref<1x4x128x8xf32, #tpu.memory_space<vmem>>, vector<1x1x128x8xf32>
    %55 = vector.shape_cast %54 : vector<1x1x128x8xf32> to vector<128x8xf32>
    %cst_64 = arith.constant dense<0.000000e+00> : vector<8x8xf32>
    %56 = tpu.matmul %3, %55, %cst_64 {dimension_numbers = #tpu.dot_dimension_numbers<[1], [0], [0], [1], [0, 0, 1, 1], [], []>} : vector<8x128xf32>, vector<128x8xf32>, vector<8x8xf32> -> vector<8x8xf32>
    %c0_65 = arith.constant 0 : index
    %c1_66 = arith.constant 1 : index
    %c0_67 = arith.constant 0 : index
    %c0_68 = arith.constant 0 : index
    %57 = vector.load %arg8[%c0_65, %c1_66, %c0_67, %c0_68] : memref<1x4x1x8xf32, #tpu.memory_space<vmem>>, vector<1x1x1x8xf32>
    %58 = vector.shape_cast %57 : vector<1x1x1x8xf32> to vector<1x8xf32>
    %59 = vector.broadcast %58 : vector<1x8xf32> to vector<8x8xf32>
    %60 = arith.addf %56, %59 : vector<8x8xf32>
    %c1_69 = arith.constant 1 : index
    %c0_70 = arith.constant 0 : index
    %c0_71 = arith.constant 0 : index
    %61 = vector.load %arg22[%c1_69, %c0_70, %c0_71] : memref<4x8x8xf32, #tpu.memory_space<vmem>>, vector<1x8x8xf32>
    %62 = vector.shape_cast %61 : vector<1x8x8xf32> to vector<8x8xf32>
    %63 = vector.shape_cast %60 : vector<8x8xf32> to vector<1x8x8xf32>
    tpu.vector_store %arg22[%c1_69, %c0_70, %c0_71], %63 {strides = array<i32>} : memref<4x8x8xf32, #tpu.memory_space<vmem>>, vector<1x8x8xf32>,
    %c0_72 = arith.constant 0 : index
    %c2 = arith.constant 2 : index
    %c0_73 = arith.constant 0 : index
    %c0_74 = arith.constant 0 : index
    %64 = vector.load %arg3[%c0_72, %c2, %c0_73, %c0_74] : memref<1x4x128x8xf32, #tpu.memory_space<vmem>>, vector<1x1x128x8xf32>
    %65 = vector.shape_cast %64 : vector<1x1x128x8xf32> to vector<128x8xf32>
    %cst_75 = arith.constant dense<0.000000e+00> : vector<8x8xf32>
    %66 = tpu.matmul %3, %65, %cst_75 {dimension_numbers = #tpu.dot_dimension_numbers<[1], [0], [0], [1], [0, 0, 1, 1], [], []>} : vector<8x128xf32>, vector<128x8xf32>, vector<8x8xf32> -> vector<8x8xf32>
    %c0_76 = arith.constant 0 : index
    %c2_77 = arith.constant 2 : index
    %c0_78 = arith.constant 0 : index
    %c0_79 = arith.constant 0 : index
    %67 = vector.load %arg6[%c0_76, %c2_77, %c0_78, %c0_79] : memref<1x4x1x8xf32, #tpu.memory_space<vmem>>, vector<1x1x1x8xf32>
    %68 = vector.shape_cast %67 : vector<1x1x1x8xf32> to vector<1x8xf32>
    %69 = vector.broadcast %68 : vector<1x8xf32> to vector<8x8xf32>
    %70 = arith.addf %66, %69 : vector<8x8xf32>
    %c2_80 = arith.constant 2 : index
    %c0_81 = arith.constant 0 : index
    %c0_82 = arith.constant 0 : index
    %71 = vector.load %arg20[%c2_80, %c0_81, %c0_82] : memref<4x8x8xf32, #tpu.memory_space<vmem>>, vector<1x8x8xf32>
    %72 = vector.shape_cast %71 : vector<1x8x8xf32> to vector<8x8xf32>
    %73 = vector.shape_cast %70 : vector<8x8xf32> to vector<1x8x8xf32>
    tpu.vector_store %arg20[%c2_80, %c0_81, %c0_82], %73 {strides = array<i32>} : memref<4x8x8xf32, #tpu.memory_space<vmem>>, vector<1x8x8xf32>,
    %c0_83 = arith.constant 0 : index
    %c2_84 = arith.constant 2 : index
    %c0_85 = arith.constant 0 : index
    %c0_86 = arith.constant 0 : index
    %74 = vector.load %arg4[%c0_83, %c2_84, %c0_85, %c0_86] : memref<1x4x128x8xf32, #tpu.memory_space<vmem>>, vector<1x1x128x8xf32>
    %75 = vector.shape_cast %74 : vector<1x1x128x8xf32> to vector<128x8xf32>
    %cst_87 = arith.constant dense<0.000000e+00> : vector<8x8xf32>
    %76 = tpu.matmul %3, %75, %cst_87 {dimension_numbers = #tpu.dot_dimension_numbers<[1], [0], [0], [1], [0, 0, 1, 1], [], []>} : vector<8x128xf32>, vector<128x8xf32>, vector<8x8xf32> -> vector<8x8xf32>
    %c0_88 = arith.constant 0 : index
    %c2_89 = arith.constant 2 : index
    %c0_90 = arith.constant 0 : index
    %c0_91 = arith.constant 0 : index
    %77 = vector.load %arg7[%c0_88, %c2_89, %c0_90, %c0_91] : memref<1x4x1x8xf32, #tpu.memory_space<vmem>>, vector<1x1x1x8xf32>
    %78 = vector.shape_cast %77 : vector<1x1x1x8xf32> to vector<1x8xf32>
    %79 = vector.broadcast %78 : vector<1x8xf32> to vector<8x8xf32>
    %80 = arith.addf %76, %79 : vector<8x8xf32>
    %c2_92 = arith.constant 2 : index
    %c0_93 = arith.constant 0 : index
    %c0_94 = arith.constant 0 : index
    %81 = vector.load %arg21[%c2_92, %c0_93, %c0_94] : memref<4x8x8xf32, #tpu.memory_space<vmem>>, vector<1x8x8xf32>
    %82 = vector.shape_cast %81 : vector<1x8x8xf32> to vector<8x8xf32>
    %83 = vector.shape_cast %80 : vector<8x8xf32> to vector<1x8x8xf32>
    tpu.vector_store %arg21[%c2_92, %c0_93, %c0_94], %83 {strides = array<i32>} : memref<4x8x8xf32, #tpu.memory_space<vmem>>, vector<1x8x8xf32>,
    %c0_95 = arith.constant 0 : index
    %c2_96 = arith.constant 2 : index
    %c0_97 = arith.constant 0 : index
    %c0_98 = arith.constant 0 : index
    %84 = vector.load %arg5[%c0_95, %c2_96, %c0_97, %c0_98] : memref<1x4x128x8xf32, #tpu.memory_space<vmem>>, vector<1x1x128x8xf32>
    %85 = vector.shape_cast %84 : vector<1x1x128x8xf32> to vector<128x8xf32>
    %cst_99 = arith.constant dense<0.000000e+00> : vector<8x8xf32>
    %86 = tpu.matmul %3, %85, %cst_99 {dimension_numbers = #tpu.dot_dimension_numbers<[1], [0], [0], [1], [0, 0, 1, 1], [], []>} : vector<8x128xf32>, vector<128x8xf32>, vector<8x8xf32> -> vector<8x8xf32>
    %c0_100 = arith.constant 0 : index
    %c2_101 = arith.constant 2 : index
    %c0_102 = arith.constant 0 : index
    %c0_103 = arith.constant 0 : index
    %87 = vector.load %arg8[%c0_100, %c2_101, %c0_102, %c0_103] : memref<1x4x1x8xf32, #tpu.memory_space<vmem>>, vector<1x1x1x8xf32>
    %88 = vector.shape_cast %87 : vector<1x1x1x8xf32> to vector<1x8xf32>
    %89 = vector.broadcast %88 : vector<1x8xf32> to vector<8x8xf32>
    %90 = arith.addf %86, %89 : vector<8x8xf32>
    %c2_104 = arith.constant 2 : index
    %c0_105 = arith.constant 0 : index
    %c0_106 = arith.constant 0 : index
    %91 = vector.load %arg22[%c2_104, %c0_105, %c0_106] : memref<4x8x8xf32, #tpu.memory_space<vmem>>, vector<1x8x8xf32>
    %92 = vector.shape_cast %91 : vector<1x8x8xf32> to vector<8x8xf32>
    %93 = vector.shape_cast %90 : vector<8x8xf32> to vector<1x8x8xf32>
    tpu.vector_store %arg22[%c2_104, %c0_105, %c0_106], %93 {strides = array<i32>} : memref<4x8x8xf32, #tpu.memory_space<vmem>>, vector<1x8x8xf32>,
    %c0_107 = arith.constant 0 : index
    %c3 = arith.constant 3 : index
    %c0_108 = arith.constant 0 : index
    %c0_109 = arith.constant 0 : index
    %94 = vector.load %arg3[%c0_107, %c3, %c0_108, %c0_109] : memref<1x4x128x8xf32, #tpu.memory_space<vmem>>, vector<1x1x128x8xf32>
    %95 = vector.shape_cast %94 : vector<1x1x128x8xf32> to vector<128x8xf32>
    %cst_110 = arith.constant dense<0.000000e+00> : vector<8x8xf32>
    %96 = tpu.matmul %3, %95, %cst_110 {dimension_numbers = #tpu.dot_dimension_numbers<[1], [0], [0], [1], [0, 0, 1, 1], [], []>} : vector<8x128xf32>, vector<128x8xf32>, vector<8x8xf32> -> vector<8x8xf32>
    %c0_111 = arith.constant 0 : index
    %c3_112 = arith.constant 3 : index
    %c0_113 = arith.constant 0 : index
    %c0_114 = arith.constant 0 : index
    %97 = vector.load %arg6[%c0_111, %c3_112, %c0_113, %c0_114] : memref<1x4x1x8xf32, #tpu.memory_space<vmem>>, vector<1x1x1x8xf32>
    %98 = vector.shape_cast %97 : vector<1x1x1x8xf32> to vector<1x8xf32>
    %99 = vector.broadcast %98 : vector<1x8xf32> to vector<8x8xf32>
    %100 = arith.addf %96, %99 : vector<8x8xf32>
    %c3_115 = arith.constant 3 : index
    %c0_116 = arith.constant 0 : index
    %c0_117 = arith.constant 0 : index
    %101 = vector.load %arg20[%c3_115, %c0_116, %c0_117] : memref<4x8x8xf32, #tpu.memory_space<vmem>>, vector<1x8x8xf32>
    %102 = vector.shape_cast %101 : vector<1x8x8xf32> to vector<8x8xf32>
    %103 = vector.shape_cast %100 : vector<8x8xf32> to vector<1x8x8xf32>
    tpu.vector_store %arg20[%c3_115, %c0_116, %c0_117], %103 {strides = array<i32>} : memref<4x8x8xf32, #tpu.memory_space<vmem>>, vector<1x8x8xf32>,
    %c0_118 = arith.constant 0 : index
    %c3_119 = arith.constant 3 : index
    %c0_120 = arith.constant 0 : index
    %c0_121 = arith.constant 0 : index
    %104 = vector.load %arg4[%c0_118, %c3_119, %c0_120, %c0_121] : memref<1x4x128x8xf32, #tpu.memory_space<vmem>>, vector<1x1x128x8xf32>
    %105 = vector.shape_cast %104 : vector<1x1x128x8xf32> to vector<128x8xf32>
    %cst_122 = arith.constant dense<0.000000e+00> : vector<8x8xf32>
    %106 = tpu.matmul %3, %105, %cst_122 {dimension_numbers = #tpu.dot_dimension_numbers<[1], [0], [0], [1], [0, 0, 1, 1], [], []>} : vector<8x128xf32>, vector<128x8xf32>, vector<8x8xf32> -> vector<8x8xf32>
    %c0_123 = arith.constant 0 : index
    %c3_124 = arith.constant 3 : index
    %c0_125 = arith.constant 0 : index
    %c0_126 = arith.constant 0 : index
    %107 = vector.load %arg7[%c0_123, %c3_124, %c0_125, %c0_126] : memref<1x4x1x8xf32, #tpu.memory_space<vmem>>, vector<1x1x1x8xf32>
    %108 = vector.shape_cast %107 : vector<1x1x1x8xf32> to vector<1x8xf32>
    %109 = vector.broadcast %108 : vector<1x8xf32> to vector<8x8xf32>
    %110 = arith.addf %106, %109 : vector<8x8xf32>
    %c3_127 = arith.constant 3 : index
    %c0_128 = arith.constant 0 : index
    %c0_129 = arith.constant 0 : index
    %111 = vector.load %arg21[%c3_127, %c0_128, %c0_129] : memref<4x8x8xf32, #tpu.memory_space<vmem>>, vector<1x8x8xf32>
    %112 = vector.shape_cast %111 : vector<1x8x8xf32> to vector<8x8xf32>
    %113 = vector.shape_cast %110 : vector<8x8xf32> to vector<1x8x8xf32>
    tpu.vector_store %arg21[%c3_127, %c0_128, %c0_129], %113 {strides = array<i32>} : memref<4x8x8xf32, #tpu.memory_space<vmem>>, vector<1x8x8xf32>,
    %c0_130 = arith.constant 0 : index
    %c3_131 = arith.constant 3 : index
    %c0_132 = arith.constant 0 : index
    %c0_133 = arith.constant 0 : index
    %114 = vector.load %arg5[%c0_130, %c3_131, %c0_132, %c0_133] : memref<1x4x128x8xf32, #tpu.memory_space<vmem>>, vector<1x1x128x8xf32>
    %115 = vector.shape_cast %114 : vector<1x1x128x8xf32> to vector<128x8xf32>
    %cst_134 = arith.constant dense<0.000000e+00> : vector<8x8xf32>
    %116 = tpu.matmul %3, %115, %cst_134 {dimension_numbers = #tpu.dot_dimension_numbers<[1], [0], [0], [1], [0, 0, 1, 1], [], []>} : vector<8x128xf32>, vector<128x8xf32>, vector<8x8xf32> -> vector<8x8xf32>
    %c0_135 = arith.constant 0 : index
    %c3_136 = arith.constant 3 : index
    %c0_137 = arith.constant 0 : index
    %c0_138 = arith.constant 0 : index
    %117 = vector.load %arg8[%c0_135, %c3_136, %c0_137, %c0_138] : memref<1x4x1x8xf32, #tpu.memory_space<vmem>>, vector<1x1x1x8xf32>
    %118 = vector.shape_cast %117 : vector<1x1x1x8xf32> to vector<1x8xf32>
    %119 = vector.broadcast %118 : vector<1x8xf32> to vector<8x8xf32>
    %120 = arith.addf %116, %119 : vector<8x8xf32>
    %c3_139 = arith.constant 3 : index
    %c0_140 = arith.constant 0 : index
    %c0_141 = arith.constant 0 : index
    %121 = vector.load %arg22[%c3_139, %c0_140, %c0_141] : memref<4x8x8xf32, #tpu.memory_space<vmem>>, vector<1x8x8xf32>
    %122 = vector.shape_cast %121 : vector<1x8x8xf32> to vector<8x8xf32>
    %123 = vector.shape_cast %120 : vector<8x8xf32> to vector<1x8x8xf32>
    tpu.vector_store %arg22[%c3_139, %c0_140, %c0_141], %123 {strides = array<i32>} : memref<4x8x8xf32, #tpu.memory_space<vmem>>, vector<1x8x8xf32>,
    %c0_142 = arith.constant 0 : index
    %c0_143 = arith.constant 0 : index
    %c0_144 = arith.constant 0 : index
    %124 = vector.load %arg20[%c0_142, %c0_143, %c0_144] : memref<4x8x8xf32, #tpu.memory_space<vmem>>, vector<4x8x8xf32>
    %c0_145 = arith.constant 0 : index
    %c0_146 = arith.constant 0 : index
    %c0_147 = arith.constant 0 : index
    %125 = vector.load %arg21[%c0_145, %c0_146, %c0_147] : memref<4x8x8xf32, #tpu.memory_space<vmem>>, vector<4x8x8xf32>
    "tpu.trace_start"() <{level = 10 : i32, message = "hqd,hkd->hqk"}> : () -> ()
    %cst_148 = arith.constant dense<0.000000e+00> : vector<4x8x8xf32>
    %126 = tpu.matmul %124, %125, %cst_148 {dimension_numbers = #tpu.dot_dimension_numbers<[2], [2], [1], [1], [0, 0, 0, 1, 1, 1], [0], [0]>} : vector<4x8x8xf32>, vector<4x8x8xf32>, vector<4x8x8xf32> -> vector<4x8x8xf32>
    "tpu.trace_stop"() : () -> ()
    %cst_149 = arith.constant 0.353553385 : f32
    %127 = vector.broadcast %cst_149 : f32 to vector<4x8x8xf32>
    %128 = arith.mulf %126, %127 : vector<4x8x8xf32>
    %c0_150 = arith.constant 0 : index
    %c0_151 = arith.constant 0 : index
    %129 = vector.load %arg1[%c0_150, %c0_151] : memref<8x8xf32, #tpu.memory_space<vmem>>, vector<8x8xf32>
    %130 = vector.shape_cast %129 : vector<8x8xf32> to vector<1x8x8xf32>
    %131 = vector.broadcast %130 : vector<1x8x8xf32> to vector<4x8x8xf32>
    %132 = arith.addf %128, %131 : vector<4x8x8xf32>
    %cst_152 = arith.constant dense<0xFF800000> : vector<4x8xf32>
    %133 = vector.multi_reduction <maximumf>, %132, %cst_152 [2] : vector<4x8x8xf32> to vector<4x8xf32>
    %134 = vector.shape_cast %133 : vector<4x8xf32> to vector<4x8x1xf32>
    %135 = vector.broadcast %134 : vector<4x8x1xf32> to vector<4x8x8xf32>
    %136 = arith.subf %132, %135 : vector<4x8x8xf32>
    %137 = math.exp %136 : vector<4x8x8xf32>
    %cst_153 = arith.constant dense<0.000000e+00> : vector<4x8xf32>
    %138 = vector.multi_reduction <add>, %137, %cst_153 [2] : vector<4x8x8xf32> to vector<4x8xf32>
    %139 = vector.shape_cast %138 : vector<4x8xf32> to vector<4x8x1xf32>
    %140 = tpu.reciprocal %139 {approx = true} : vector<4x8x1xf32> -> vector<4x8x1xf32>
    %141 = vector.broadcast %140 : vector<4x8x1xf32> to vector<4x8x8xf32>
    %142 = arith.mulf %137, %141 : vector<4x8x8xf32>
    %c0_154 = arith.constant 0 : index
    %c0_155 = arith.constant 0 : index
    %c0_156 = arith.constant 0 : index
    %143 = vector.load %arg22[%c0_154, %c0_155, %c0_156] : memref<4x8x8xf32, #tpu.memory_space<vmem>>, vector<4x8x8xf32>
    "tpu.trace_start"() <{level = 10 : i32, message = "hqk,hkd->hqd"}> : () -> ()
    %cst_157 = arith.constant dense<0.000000e+00> : vector<4x8x8xf32>
    %144 = tpu.matmul %142, %143, %cst_157 {dimension_numbers = #tpu.dot_dimension_numbers<[2], [1], [1], [2], [0, 0, 0, 1, 1, 2], [0], [0]>} : vector<4x8x8xf32>, vector<4x8x8xf32>, vector<4x8x8xf32> -> vector<4x8x8xf32>
    "tpu.trace_stop"() : () -> ()
    %c0_158 = arith.constant 0 : index
    %c0_159 = arith.constant 0 : index
    %c0_160 = arith.constant 0 : index
    %145 = vector.load %arg23[%c0_158, %c0_159, %c0_160] : memref<4x8x8xf32, #tpu.memory_space<vmem>>, vector<4x8x8xf32>
    tpu.vector_store %arg23[%c0_158, %c0_159, %c0_160], %144 {strides = array<i32>} : memref<4x8x8xf32, #tpu.memory_space<vmem>>, vector<4x8x8xf32>,
    %c0_161 = arith.constant 0 : index
    %c0_162 = arith.constant 0 : index
    %c0_163 = arith.constant 0 : index
    %146 = vector.load %arg10[%c0_161, %c0_162, %c0_163] : memref<1x1x128xf32, #tpu.memory_space<vmem>>, vector<1x1x128xf32>
    %147 = vector.shape_cast %146 : vector<1x1x128xf32> to vector<1x128xf32>
    %c0_164 = arith.constant 0 : index
    %c0_165 = arith.constant 0 : index
    %c0_166 = arith.constant 0 : index
    %148 = vector.load %arg23[%c0_164, %c0_165, %c0_166] : memref<4x8x8xf32, #tpu.memory_space<vmem>>, vector<1x8x8xf32>
    %149 = vector.shape_cast %148 : vector<1x8x8xf32> to vector<8x8xf32>
    %c0_167 = arith.constant 0 : index
    %c0_168 = arith.constant 0 : index
    %c0_169 = arith.constant 0 : index
    %c0_170 = arith.constant 0 : index
    %150 = vector.load %arg9[%c0_167, %c0_168, %c0_169, %c0_170] : memref<1x4x8x128xf32, #tpu.memory_space<vmem>>, vector<1x1x8x128xf32>
    %151 = vector.shape_cast %150 : vector<1x1x8x128xf32> to vector<8x128xf32>
    %cst_171 = arith.constant dense<0.000000e+00> : vector<8x128xf32>
    %152 = tpu.matmul %149, %151, %cst_171 {dimension_numbers = #tpu.dot_dimension_numbers<[1], [0], [0], [1], [0, 0, 1, 1], [], []>} : vector<8x8xf32>, vector<8x128xf32>, vector<8x128xf32> -> vector<8x128xf32>
    %153 = vector.broadcast %147 : vector<1x128xf32> to vector<8x128xf32>
    %154 = arith.addf %153, %152 : vector<8x128xf32>
    %c1_172 = arith.constant 1 : index
    %c0_173 = arith.constant 0 : index
    %c0_174 = arith.constant 0 : index
    %155 = vector.load %arg23[%c1_172, %c0_173, %c0_174] : memref<4x8x8xf32, #tpu.memory_space<vmem>>, vector<1x8x8xf32>
    %156 = vector.shape_cast %155 : vector<1x8x8xf32> to vector<8x8xf32>
    %c0_175 = arith.constant 0 : index
    %c1_176 = arith.constant 1 : index
    %c0_177 = arith.constant 0 : index
    %c0_178 = arith.constant 0 : index
    %157 = vector.load %arg9[%c0_175, %c1_176, %c0_177, %c0_178] : memref<1x4x8x128xf32, #tpu.memory_space<vmem>>, vector<1x1x8x128xf32>
    %158 = vector.shape_cast %157 : vector<1x1x8x128xf32> to vector<8x128xf32>
    %cst_179 = arith.constant dense<0.000000e+00> : vector<8x128xf32>
    %159 = tpu.matmul %156, %158, %cst_179 {dimension_numbers = #tpu.dot_dimension_numbers<[1], [0], [0], [1], [0, 0, 1, 1], [], []>} : vector<8x8xf32>, vector<8x128xf32>, vector<8x128xf32> -> vector<8x128xf32>
    %160 = arith.addf %154, %159 : vector<8x128xf32>
    %c2_180 = arith.constant 2 : index
    %c0_181 = arith.constant 0 : index
    %c0_182 = arith.constant 0 : index
    %161 = vector.load %arg23[%c2_180, %c0_181, %c0_182] : memref<4x8x8xf32, #tpu.memory_space<vmem>>, vector<1x8x8xf32>
    %162 = vector.shape_cast %161 : vector<1x8x8xf32> to vector<8x8xf32>
    %c0_183 = arith.constant 0 : index
    %c2_184 = arith.constant 2 : index
    %c0_185 = arith.constant 0 : index
    %c0_186 = arith.constant 0 : index
    %163 = vector.load %arg9[%c0_183, %c2_184, %c0_185, %c0_186] : memref<1x4x8x128xf32, #tpu.memory_space<vmem>>, vector<1x1x8x128xf32>
    %164 = vector.shape_cast %163 : vector<1x1x8x128xf32> to vector<8x128xf32>
    %cst_187 = arith.constant dense<0.000000e+00> : vector<8x128xf32>
    %165 = tpu.matmul %162, %164, %cst_187 {dimension_numbers = #tpu.dot_dimension_numbers<[1], [0], [0], [1], [0, 0, 1, 1], [], []>} : vector<8x8xf32>, vector<8x128xf32>, vector<8x128xf32> -> vector<8x128xf32>
    %166 = arith.addf %160, %165 : vector<8x128xf32>
    %c3_188 = arith.constant 3 : index
    %c0_189 = arith.constant 0 : index
    %c0_190 = arith.constant 0 : index
    %167 = vector.load %arg23[%c3_188, %c0_189, %c0_190] : memref<4x8x8xf32, #tpu.memory_space<vmem>>, vector<1x8x8xf32>
    %168 = vector.shape_cast %167 : vector<1x8x8xf32> to vector<8x8xf32>
    %c0_191 = arith.constant 0 : index
    %c3_192 = arith.constant 3 : index
    %c0_193 = arith.constant 0 : index
    %c0_194 = arith.constant 0 : index
    %169 = vector.load %arg9[%c0_191, %c3_192, %c0_193, %c0_194] : memref<1x4x8x128xf32, #tpu.memory_space<vmem>>, vector<1x1x8x128xf32>
    %170 = vector.shape_cast %169 : vector<1x1x8x128xf32> to vector<8x128xf32>
    %cst_195 = arith.constant dense<0.000000e+00> : vector<8x128xf32>
    %171 = tpu.matmul %168, %170, %cst_195 {dimension_numbers = #tpu.dot_dimension_numbers<[1], [0], [0], [1], [0, 0, 1, 1], [], []>} : vector<8x8xf32>, vector<8x128xf32>, vector<8x128xf32> -> vector<8x128xf32>
    %172 = arith.addf %166, %171 : vector<8x128xf32>
    %173 = arith.addf %3, %172 : vector<8x128xf32>
    %cst_196 = arith.constant dense<0.000000e+00> : vector<8xf32>
    %174 = vector.multi_reduction <add>, %173, %cst_196 [1] : vector<8x128xf32> to vector<8xf32>
    %175 = vector.shape_cast %174 : vector<8xf32> to vector<8x1xf32>
    %cst_197 = arith.constant 3.200000e+01 : f32
    %176 = vector.broadcast %cst_197 : f32 to vector<8x1xf32>
    %177 = arith.divf %175, %176 : vector<8x1xf32>
    %178 = arith.mulf %173, %173 : vector<8x128xf32>
    %cst_198 = arith.constant dense<0.000000e+00> : vector<8xf32>
    %179 = vector.multi_reduction <add>, %178, %cst_198 [1] : vector<8x128xf32> to vector<8xf32>
    %180 = vector.shape_cast %179 : vector<8xf32> to vector<8x1xf32>
    %cst_199 = arith.constant 3.200000e+01 : f32
    %181 = vector.broadcast %cst_199 : f32 to vector<8x1xf32>
    %182 = arith.divf %180, %181 : vector<8x1xf32>
    %183 = arith.mulf %177, %177 : vector<8x1xf32>
    %184 = arith.subf %182, %183 : vector<8x1xf32>
    %185 = vector.broadcast %177 : vector<8x1xf32> to vector<8x128xf32>
    %186 = arith.subf %173, %185 : vector<8x128xf32>
    %cst_200 = arith.constant 9.99999974E-6 : f32
    %187 = vector.broadcast %cst_200 : f32 to vector<8x1xf32>
    %188 = arith.addf %184, %187 : vector<8x1xf32>
    %189 = math.rsqrt %188 : vector<8x1xf32>
    %190 = vector.broadcast %189 : vector<8x1xf32> to vector<8x128xf32>
    %191 = arith.mulf %186, %190 : vector<8x128xf32>
    %c0_201 = arith.constant 0 : index
    %c0_202 = arith.constant 0 : index
    %c0_203 = arith.constant 0 : index
    %192 = vector.load %arg11[%c0_201, %c0_202, %c0_203] : memref<1x1x128xf32, #tpu.memory_space<vmem>>, vector<1x1x128xf32>
    %193 = vector.shape_cast %192 : vector<1x1x128xf32> to vector<1x128xf32>
    %194 = vector.broadcast %193 : vector<1x128xf32> to vector<8x128xf32>
    %195 = arith.mulf %191, %194 : vector<8x128xf32>
    %c0_204 = arith.constant 0 : index
    %c0_205 = arith.constant 0 : index
    %c0_206 = arith.constant 0 : index
    %196 = vector.load %arg12[%c0_204, %c0_205, %c0_206] : memref<1x1x128xf32, #tpu.memory_space<vmem>>, vector<1x1x128xf32>
    %197 = vector.shape_cast %196 : vector<1x1x128xf32> to vector<1x128xf32>
    %198 = vector.broadcast %197 : vector<1x128xf32> to vector<8x128xf32>
    %199 = arith.addf %195, %198 : vector<8x128xf32>
    %c0_207 = arith.constant 0 : index
    %c0_208 = arith.constant 0 : index
    %c0_209 = arith.constant 0 : index
    %200 = vector.load %arg13[%c0_207, %c0_208, %c0_209] : memref<1x128x128xf32, #tpu.memory_space<vmem>>, vector<1x128x128xf32>
    %201 = vector.shape_cast %200 : vector<1x128x128xf32> to vector<128x128xf32>
    %cst_210 = arith.constant dense<0.000000e+00> : vector<8x128xf32>
    %202 = tpu.matmul %199, %201, %cst_210 {dimension_numbers = #tpu.dot_dimension_numbers<[1], [0], [0], [1], [0, 0, 1, 1], [], []>} : vector<8x128xf32>, vector<128x128xf32>, vector<8x128xf32> -> vector<8x128xf32>
    %c0_211 = arith.constant 0 : index
    %c0_212 = arith.constant 0 : index
    %c0_213 = arith.constant 0 : index
    %203 = vector.load %arg14[%c0_211, %c0_212, %c0_213] : memref<1x1x128xf32, #tpu.memory_space<vmem>>, vector<1x1x128xf32>
    %204 = vector.shape_cast %203 : vector<1x1x128xf32> to vector<1x128xf32>
    %205 = vector.broadcast %204 : vector<1x128xf32> to vector<8x128xf32>
    %206 = arith.addf %202, %205 : vector<8x128xf32>
    %cst_214 = arith.constant 0.000000e+00 : f32
    %207 = vector.broadcast %cst_214 : f32 to vector<8x128xf32>
    %208 = arith.maximumf %206, %207 : vector<8x128xf32>
    %c0_215 = arith.constant 0 : index
    %c0_216 = arith.constant 0 : index
    %c0_217 = arith.constant 0 : index
    %209 = vector.load %arg15[%c0_215, %c0_216, %c0_217] : memref<1x128x128xf32, #tpu.memory_space<vmem>>, vector<1x128x128xf32>
    %210 = vector.shape_cast %209 : vector<1x128x128xf32> to vector<128x128xf32>
    %cst_218 = arith.constant dense<0.000000e+00> : vector<8x128xf32>
    %211 = tpu.matmul %208, %210, %cst_218 {dimension_numbers = #tpu.dot_dimension_numbers<[1], [0], [0], [1], [0, 0, 1, 1], [], []>} : vector<8x128xf32>, vector<128x128xf32>, vector<8x128xf32> -> vector<8x128xf32>
    %c0_219 = arith.constant 0 : index
    %c0_220 = arith.constant 0 : index
    %c0_221 = arith.constant 0 : index
    %212 = vector.load %arg16[%c0_219, %c0_220, %c0_221] : memref<1x1x128xf32, #tpu.memory_space<vmem>>, vector<1x1x128xf32>
    %213 = vector.shape_cast %212 : vector<1x1x128xf32> to vector<1x128xf32>
    %214 = vector.broadcast %213 : vector<1x128xf32> to vector<8x128xf32>
    %215 = arith.addf %211, %214 : vector<8x128xf32>
    %216 = arith.addf %199, %215 : vector<8x128xf32>
    %cst_222 = arith.constant dense<0.000000e+00> : vector<8xf32>
    %217 = vector.multi_reduction <add>, %216, %cst_222 [1] : vector<8x128xf32> to vector<8xf32>
    %218 = vector.shape_cast %217 : vector<8xf32> to vector<8x1xf32>
    %cst_223 = arith.constant 3.200000e+01 : f32
    %219 = vector.broadcast %cst_223 : f32 to vector<8x1xf32>
    %220 = arith.divf %218, %219 : vector<8x1xf32>
    %221 = arith.mulf %216, %216 : vector<8x128xf32>
    %cst_224 = arith.constant dense<0.000000e+00> : vector<8xf32>
    %222 = vector.multi_reduction <add>, %221, %cst_224 [1] : vector<8x128xf32> to vector<8xf32>
    %223 = vector.shape_cast %222 : vector<8xf32> to vector<8x1xf32>
    %cst_225 = arith.constant 3.200000e+01 : f32
    %224 = vector.broadcast %cst_225 : f32 to vector<8x1xf32>
    %225 = arith.divf %223, %224 : vector<8x1xf32>
    %226 = arith.mulf %220, %220 : vector<8x1xf32>
    %227 = arith.subf %225, %226 : vector<8x1xf32>
    %228 = vector.broadcast %220 : vector<8x1xf32> to vector<8x128xf32>
    %229 = arith.subf %216, %228 : vector<8x128xf32>
    %cst_226 = arith.constant 9.99999974E-6 : f32
    %230 = vector.broadcast %cst_226 : f32 to vector<8x1xf32>
    %231 = arith.addf %227, %230 : vector<8x1xf32>
    %232 = math.rsqrt %231 : vector<8x1xf32>
    %233 = vector.broadcast %232 : vector<8x1xf32> to vector<8x128xf32>
    %234 = arith.mulf %229, %233 : vector<8x128xf32>
    %c0_227 = arith.constant 0 : index
    %c0_228 = arith.constant 0 : index
    %c0_229 = arith.constant 0 : index
    %235 = vector.load %arg17[%c0_227, %c0_228, %c0_229] : memref<1x1x128xf32, #tpu.memory_space<vmem>>, vector<1x1x128xf32>
    %236 = vector.shape_cast %235 : vector<1x1x128xf32> to vector<1x128xf32>
    %237 = vector.broadcast %236 : vector<1x128xf32> to vector<8x128xf32>
    %238 = arith.mulf %234, %237 : vector<8x128xf32>
    %c0_230 = arith.constant 0 : index
    %c0_231 = arith.constant 0 : index
    %c0_232 = arith.constant 0 : index
    %239 = vector.load %arg18[%c0_230, %c0_231, %c0_232] : memref<1x1x128xf32, #tpu.memory_space<vmem>>, vector<1x1x128xf32>
    %240 = vector.shape_cast %239 : vector<1x1x128xf32> to vector<1x128xf32>
    %241 = vector.broadcast %240 : vector<1x128xf32> to vector<8x128xf32>
    %242 = arith.addf %238, %241 : vector<8x128xf32>
    %c0_233 = arith.constant 0 : index
    %c0_234 = arith.constant 0 : index
    %243 = vector.load %arg19[%c0_233, %c0_234] : memref<8x128xf32, #tpu.memory_space<vmem>>, vector<8x128xf32>
    tpu.vector_store %arg19[%c0_233, %c0_234], %242 {strides = array<i32>} : memref<8x128xf32, #tpu.memory_space<vmem>>, vector<8x128xf32>,
    return
  }
  func.func @transform_0(%arg0: i32) -> (i32, i32) {
    %c0_i32 = arith.constant 0 : i32
    %c0_i32_0 = arith.constant 0 : i32
    %c0_i32_1 = arith.constant 0 : i32
    return %c0_i32, %c0_i32_0 : i32, i32
  }
  func.func @transform_1(%arg0: i32) -> (i32, i32) {
    %c0_i32 = arith.constant 0 : i32
    %c0_i32_0 = arith.constant 0 : i32
    %c0_i32_1 = arith.constant 0 : i32
    return %c0_i32, %c0_i32_0 : i32, i32
  }
  func.func @transform_2(%arg0: i32) -> (i32, i32, i32, i32) {
    %c0_i32 = arith.constant 0 : i32
    %c0_i32_0 = arith.constant 0 : i32
    %c0_i32_1 = arith.constant 0 : i32
    %c0_i32_2 = arith.constant 0 : i32
    return %arg0, %c0_i32, %c0_i32_0, %c0_i32_1 : i32, i32, i32, i32
  }
  func.func @transform_3(%arg0: i32) -> (i32, i32, i32, i32) {
    %c0_i32 = arith.constant 0 : i32
    %c0_i32_0 = arith.constant 0 : i32
    %c0_i32_1 = arith.constant 0 : i32
    %c0_i32_2 = arith.constant 0 : i32
    return %arg0, %c0_i32, %c0_i32_0, %c0_i32_1 : i32, i32, i32, i32
  }
  func.func @transform_4(%arg0: i32) -> (i32, i32, i32, i32) {
    %c0_i32 = arith.constant 0 : i32
    %c0_i32_0 = arith.constant 0 : i32
    %c0_i32_1 = arith.constant 0 : i32
    %c0_i32_2 = arith.constant 0 : i32
    return %arg0, %c0_i32, %c0_i32_0, %c0_i32_1 : i32, i32, i32, i32
  }
  func.func @transform_5(%arg0: i32) -> (i32, i32, i32, i32) {
    %c0_i32 = arith.constant 0 : i32
    %c0_i32_0 = arith.constant 0 : i32
    %c0_i32_1 = arith.constant 0 : i32
    %c0_i32_2 = arith.constant 0 : i32
    return %arg0, %c0_i32, %c0_i32_0, %c0_i32_1 : i32, i32, i32, i32
  }
  func.func @transform_6(%arg0: i32) -> (i32, i32, i32, i32) {
    %c0_i32 = arith.constant 0 : i32
    %c0_i32_0 = arith.constant 0 : i32
    %c0_i32_1 = arith.constant 0 : i32
    %c0_i32_2 = arith.constant 0 : i32
    return %arg0, %c0_i32, %c0_i32_0, %c0_i32_1 : i32, i32, i32, i32
  }
  func.func @transform_7(%arg0: i32) -> (i32, i32, i32, i32) {
    %c0_i32 = arith.constant 0 : i32
    %c0_i32_0 = arith.constant 0 : i32
    %c0_i32_1 = arith.constant 0 : i32
    %c0_i32_2 = arith.constant 0 : i32
    return %arg0, %c0_i32, %c0_i32_0, %c0_i32_1 : i32, i32, i32, i32
  }
  func.func @transform_8(%arg0: i32) -> (i32, i32, i32, i32) {
    %c0_i32 = arith.constant 0 : i32
    %c0_i32_0 = arith.constant 0 : i32
    %c0_i32_1 = arith.constant 0 : i32
    %c0_i32_2 = arith.constant 0 : i32
    return %arg0, %c0_i32, %c0_i32_0, %c0_i32_1 : i32, i32, i32, i32
  }
  func.func @transform_9(%arg0: i32) -> (i32, i32, i32) {
    %c0_i32 = arith.constant 0 : i32
    %c0_i32_0 = arith.constant 0 : i32
    %c0_i32_1 = arith.constant 0 : i32
    return %arg0, %c0_i32, %c0_i32_0 : i32, i32, i32
  }
  func.func @transform_10(%arg0: i32) -> (i32, i32, i32) {
    %c0_i32 = arith.constant 0 : i32
    %c0_i32_0 = arith.constant 0 : i32
    %c0_i32_1 = arith.constant 0 : i32
    return %arg0, %c0_i32, %c0_i32_0 : i32, i32, i32
  }
  func.func @transform_11(%arg0: i32) -> (i32, i32, i32) {
    %c0_i32 = arith.constant 0 : i32
    %c0_i32_0 = arith.constant 0 : i32
    %c0_i32_1 = arith.constant 0 : i32
    return %arg0, %c0_i32, %c0_i32_0 : i32, i32, i32
  }
  func.func @transform_12(%arg0: i32) -> (i32, i32, i32) {
    %c0_i32 = arith.constant 0 : i32
    %c0_i32_0 = arith.constant 0 : i32
    %c0_i32_1 = arith.constant 0 : i32
    return %arg0, %c0_i32, %c0_i32_0 : i32, i32, i32
  }
  func.func @transform_13(%arg0: i32) -> (i32, i32, i32) {
    %c0_i32 = arith.constant 0 : i32
    %c0_i32_0 = arith.constant 0 : i32
    %c0_i32_1 = arith.constant 0 : i32
    return %arg0, %c0_i32, %c0_i32_0 : i32, i32, i32
  }
  func.func @transform_14(%arg0: i32) -> (i32, i32, i32) {
    %c0_i32 = arith.constant 0 : i32
    %c0_i32_0 = arith.constant 0 : i32
    %c0_i32_1 = arith.constant 0 : i32
    return %arg0, %c0_i32, %c0_i32_0 : i32, i32, i32
  }
  func.func @transform_15(%arg0: i32) -> (i32, i32, i32) {
    %c0_i32 = arith.constant 0 : i32
    %c0_i32_0 = arith.constant 0 : i32
    %c0_i32_1 = arith.constant 0 : i32
    return %arg0, %c0_i32, %c0_i32_0 : i32, i32, i32
  }
  func.func @transform_16(%arg0: i32) -> (i32, i32, i32) {
    %c0_i32 = arith.constant 0 : i32
    %c0_i32_0 = arith.constant 0 : i32
    %c0_i32_1 = arith.constant 0 : i32
    return %arg0, %c0_i32, %c0_i32_0 : i32, i32, i32
  }
  func.func @transform_17(%arg0: i32) -> (i32, i32, i32) {
    %c0_i32 = arith.constant 0 : i32
    %c0_i32_0 = arith.constant 0 : i32
    %c0_i32_1 = arith.constant 0 : i32
    return %arg0, %c0_i32, %c0_i32_0 : i32, i32, i32
  }
  func.func @transform_18(%arg0: i32) -> (i32, i32) {
    %c0_i32 = arith.constant 0 : i32
    %c0_i32_0 = arith.constant 0 : i32
    %c0_i32_1 = arith.constant 0 : i32
    return %c0_i32, %c0_i32_0 : i32, i32
  }
}

</mosaic_0001>

<bundles_post_ra>
// kernel: decoder_only_transformer.1
= control target key start
LH: loop header
LB: loop body
LE: loop exit
PB: predicated region body
PF: predicated region fallthrough
CT: control target
= control target key end

     0   :  { %s5590_s0 = inlined_call_operand.vmem [shape: f32[8,8], index: 0, kind: input, shape index: {}]   ;;  %s5591_s1 = inlined_call_operand.vmem [shape: f32[8,128], index: 1, kind: input, shape index: {}]   ;;  %s5592_s2 = inlined_call_operand.vmem [shape: f32[2,4,128,8], index: 2, kind: input, shape index: {}]   ;;  %s5593_s3 = inlined_call_operand.vmem [shape: f32[2,4,128,8], index: 3, kind: input, shape index: {}]   ;;  %s5594_s4 = inlined_call_operand.vmem [shape: f32[2,4,128,8], index: 4, kind: input, shape index: {}]   ;;  %s5595_s5 = inlined_call_operand.vmem [shape: f32[2,4,1,8], index: 5, kind: input, shape index: {}]   ;;  %s5596_s6 = inlined_call_operand.vmem [shape: f32[2,4,1,8], index: 6, kind: input, shape index: {}]   ;;  %s5597_s7 = inlined_call_operand.vmem [shape: f32[2,4,1,8], index: 7, kind: input, shape index: {}]   ;;  %s5598_s8 = inlined_call_operand.vmem [shape: f32[2,4,8,128], index: 8, kind: input, shape index: {}]   ;;  %s5599_s9 = inlined_call_operand.vmem [shape: f32[2,1,128], index: 9, kind: input, shape index: {}]   ;;  %s5600_s10 = inlined_call_operand.vmem [shape: f32[2,1,128], index: 10, kind: input, shape index: {}]   ;;  %s5601_s11 = inlined_call_operand.vmem [shape: f32[2,1,128], index: 11, kind: input, shape index: {}]   ;;  %s5602_s12 = inlined_call_operand.vmem [shape: f32[2,128,128], index: 12, kind: input, shape index: {}]   ;;  %s5603_s13 = inlined_call_operand.vmem [shape: f32[2,1,128], index: 13, kind: input, shape index: {}]   ;;  %s5604_s14 = inlined_call_operand.vmem [shape: f32[2,128,128], index: 14, kind: input, shape index: {}]   ;;  %s5605_s15 = inlined_call_operand.vmem [shape: f32[2,1,128], index: 15, kind: input, shape index: {}]   ;;  %s5606_s16 = inlined_call_operand.vmem [shape: f32[2,1,128], index: 16, kind: input, shape index: {}]   ;;  %s5607_s17 = inlined_call_operand.vmem [shape: f32[2,1,128], index: 17, kind: input, shape index: {}]   ;;  %s5608_s18 = inlined_call_operand.hbm [shape: f32[8,128], index: 18, kind: output, shape index: {}]  }
   0x1   :  { %5616 = sst [smem:[#allocation14_spill]] %s5590_s0 }
   0x2   :  { %5617 = sst [smem:[#allocation15_spill]] %s5591_s1 }
   0x3   :  { %5618 = sst [smem:[#allocation16_spill]] %s5592_s2 }
   0x4   :  { %5619 = sst [smem:[#allocation17_spill]] %s5593_s3 }
   0x5   :  { %5620 = sst [smem:[#allocation18_spill]] %s5594_s4 }
   0x6   :  { %5621 = sst [smem:[#allocation19_spill]] %s5595_s5 }
   0x7   :  { %5622 = sst [smem:[#allocation20_spill]] %s5596_s6 }
   0x8   :  { %5623 = sst [smem:[#allocation21_spill]] %s5597_s7 }
   0x9   :  { %5624 = sst [smem:[#allocation22_spill]] %s5598_s8 }
   0xa   :  { %5625 = sst [smem:[#allocation23_spill]] %s5602_s12 }
   0xb   :  { %5626 = sst [smem:[#allocation24_spill]] %s5608_s18 }
   0xc   :  { %23 = vsyncpa [#allocation7], 0  ;;  %s4955_s27 = smov 0  }
   0xd LB: > { %5627 = sst [smem:[#allocation9_spill]] %s4854_s27  ;;  %s4961_s28 = sadd.s32 4294967295, %s4854_s27   ;;  %s4854_s27 = sphi %s4955_s27, %s29_s27  }
   0xe   : > { %5628 = sst [smem:[#allocation10_spill]] %s4961_s28  ;;  %p3413_p0 = scmp.ge.s32.totalorder %s4854_s27, 1 }
   0xf   : > { %p641_p1 = scmp.lt.s32.totalorder %s4854_s27, 3 }
  0x11   : > { %p642_p2 = pnand %p3413_p0, %p641_p1 }
  0x13   : > { %645 = sbr.rel (%p642_p2) target bundleno = 2229 (0x8b5), region = 92 }
  0x1a   : > { %p748_p3 = scmp.lt.s32.totalorder %s4961_s28, 1  ;;  %s5629_s20 = sld [smem:[#allocation16_spill]] }
  0x1b   : > { %s5630_s3 = sld [smem:[#allocation17_spill]]  ;;  %s5632_s4 = sld [smem:[#allocation18_spill]] }
  0x1c   : > { %s4967_s29 = scalar_select %p748_p3, %s4961_s28, 1 }
  0x1d   : > { %s5634_s5 = sld [smem:[#allocation19_spill]]  ;;  %s5635_s6 = sld [smem:[#allocation20_spill]] }
  0x1e   : > { %s3625_s30 = sshll.u32 %s4967_s29, 9  ;;  %s3420_s0 = sshll.u32 %s4967_s29, 2 }
  0x1f   : > { %s5636_s7 = sld [smem:[#allocation21_spill]]  ;;  %s5638_s8 = sld [smem:[#allocation22_spill]] }
  0x20   : > { %s4974_s21 = scalar_lea.vmem %s5629_s20, %s3625_s30  ;;  %s5639_s12 = sld [smem:[#allocation23_spill]] }
  0x21   : > { %s4979_s23 = scalar_lea.vmem %s5630_s3, %s3625_s30  ;;  %s4984_s26 = scalar_lea.vmem %s5632_s4, %s3625_s30 }
  0x22   : > { %5631 = sst [smem:[#allocation11_spill]] %s4979_s23  ;;  %s3628_s23 = sshll.u32 %s4967_s29, 5 }
  0x23   : > { %5633 = sst [smem:[#allocation12_spill]] %s4984_s26  ;;  %s4989_s28 = scalar_lea.vmem %s5634_s5, %s3420_s0 }
  0x24   : > { %s4994_s20 = scalar_lea.vmem %s5635_s6, %s3420_s0  ;;  %s796_s4 = scalar_lea.vmem %s5603_s13, %s4967_s29 }
  0x25   : > { %s4999_s3 = scalar_lea.vmem %s5636_s7, %s3420_s0  ;;  %s5009_s18 = scalar_lea.vmem %s5638_s8, %s3628_s23 }
  0x26   : > { %5637 = sst [smem:[#allocation13_spill]] %s4999_s3  ;;  %s3629_s0 = sshll.u32 %s4967_s29, 7 }
  0x27   : > { %s5023_s3 = scalar_lea.vmem %s5639_s12, %s3629_s0  ;;  %s5032_s30 = scalar_lea.vmem %s5604_s14, %s3629_s0 }
  0x28   : > { %s804_s6 = scalar_lea.vmem %s5605_s15, %s4967_s29  ;;  %s807_s19 = scalar_lea.vmem %s5606_s16, %s4967_s29 }
  0x29   : > { %s810_s8 = scalar_lea.vmem %s5607_s17, %s4967_s29  ;;  %s5640_s12 = sld [smem:[#allocation10_spill]] }
  0x2f   : > { %p3429_p4 = scmp.ne.s32.totalorder %s5640_s12, 0 }
  0x30   : > { %s5641_s23 = sld [smem:[#allocation15_spill]] (!%p3429_p4) }
  0x31   : > { %814 = sbr.rel (%p3429_p4) target bundleno = 56 (0x38), region = 96 }
  0x36   : > { %v815_v0 = vld [vmem:[%s5641_s23] sm:$0xff] (!%p3429_p4) }
  0x37   : > { %816 = vst [vmem:[#allocation6] sm:$0xff] (!%p3429_p4), %v815_v0 }
  0x38 PF: > { %s5642_s0 = sld [smem:[#allocation11_spill]]  ;;  %v818_v1 = vld [vmem:[%s4974_s21] sm:$0xff]  ;;  %v819_v2 = vld [vmem:[%s4974_s21 + $0x8] sm:$0xff]  ;;  %v4856_v4 = vmov 0.0|0.0   ;;  %v820_v7 = vld [vmem:[%s4974_s21 + $0x10] sm:$0xff]  ;;  %vm4857_vm0 = vmmov 0   ;;  %s5646_s5 = scalar_lea.vmem %s5599_s9, %s4967_s29 }
  0x39   : > { %4443 = vmatprep.subr.bf16.mxu0 %v4856_v4  ;;  %4467 = vmatprep.subr.bf16.mxu1 %v4856_v4  ;;  %v4444_v5 = vpack.c.bf16 %v819_v2, %v818_v1  ;;  %v821_v8 = vld [vmem:[%s4974_s21 + $0x18] sm:$0xff]  ;;  %v4858_v12 = vmov 0.0   ;;  %v822_v15 = vld [vmem:[%s4974_s21 + $0x20] sm:$0xff]  ;;  %v823_v16 = vld [vmem:[%s4974_s21 + $0x28] sm:$0xff]  ;;  %s5643_s12 = sld [smem:[#allocation12_spill]]  ;;  %vm911_vm1 = vcmask 64512   ;;  %s5647_s1 = scalar_lea.vmem %s5600_s10, %s4967_s29 }
  0x3a   : > { %3925 = vmatprep.mubr.msk.f32.mxu0 %vm4857_vm0, %v4858_v12  ;;  %3960 = vmatprep.mubr.msk.f32.mxu1 %vm4857_vm0, %v4858_v12  ;;  %v4447_v13 = vpack.c.bf16 %v821_v8, %v820_v7  ;;  %v4450_v19 = vpack.c.bf16 %v823_v16, %v822_v15  ;;  %v824_v21 = vld [vmem:[%s4974_s21 + $0x30] sm:$0xff]  ;;  %v825_v22 = vld [vmem:[%s4974_s21 + $0x38] sm:$0xff]  ;;  %v826_v27 = vld [vmem:[%s4974_s21 + $0x40] sm:$0xff]  ;;  %s5645_s22 = sld [smem:[#allocation14_spill]]  ;;  %s5648_s24 = scalar_lea.vmem %s5601_s11, %s4967_s29 }
  0x3b   : > { %4445 = vmatpush3.bf16.msra.mxu0 %v4444_v5  ;;  %v4453_v25 = vpack.c.bf16 %v825_v22, %v824_v21  ;;  %v827_v28 = vld [vmem:[%s4974_s21 + $0x48] sm:$0xff]  ;;  %v828_v33 = vld [vmem:[%s4974_s21 + $0x50] sm:$0xff]  ;;  %v829_v34 = vld [vmem:[%s4974_s21 + $0x58] sm:$0xff] }
  0x3c   : > { %4446 = vmatprep.subr.bf16.mxu0 %v4856_v4  ;;  %v4456_v31 = vpack.c.bf16 %v827_v28, %v826_v27  ;;  %v4459_v37 = vpack.c.bf16 %v829_v34, %v828_v33  ;;  %v830_v39 = vld [vmem:[%s4974_s21 + $0x60] sm:$0xff]  ;;  %v831_v40 = vld [vmem:[%s4974_s21 + $0x68] sm:$0xff]  ;;  %v832_v45 = vld [vmem:[%s4974_s21 + $0x70] sm:$0xff] }
  0x3d   : > { %v4462_v43 = vpack.c.bf16 %v831_v40, %v830_v39  ;;  %v833_v46 = vld [vmem:[%s4974_s21 + $0x78] sm:$0xff]  ;;  %v3433_v53 = vld [vmem:[%s4974_s21 + $0x80] sm:$0xff]  ;;  %v3434_v54 = vld [vmem:[%s4974_s21 + $0x88] sm:$0xff] }
  0x3e   : > { %v913_v3 = vld [vmem:[%s5642_s0] sm:$0xff]  ;;  %v914_v6 = vld [vmem:[%s5642_s0 + $0x8] sm:$0xff]  ;;  %v915_v10 = vld [vmem:[%s5642_s0 + $0x10] sm:$0xff]  ;;  %v4465_v49 = vpack.c.bf16 %v833_v46, %v832_v45  ;;  %v4516_v57 = vpack.c.bf16 %v3434_v54, %v3433_v53 }
  0x3f   : > { %v4468_v9 = vpack.c.bf16 %v914_v6, %v913_v3  ;;  %v916_v11 = vld [vmem:[%s5642_s0 + $0x18] sm:$0xff]  ;;  %v917_v17 = vld [vmem:[%s5642_s0 + $0x20] sm:$0xff]  ;;  %v918_v18 = vld [vmem:[%s5642_s0 + $0x28] sm:$0xff]  ;;  %4448 = vmatpush3.bf16.msra.mxu0 %v4447_v13 }
  0x40   : > { %v4471_v14 = vpack.c.bf16 %v916_v11, %v915_v10  ;;  %4449 = vmatprep.subr.bf16.mxu0 %v4856_v4  ;;  %v4474_v20 = vpack.c.bf16 %v918_v18, %v917_v17  ;;  %v919_v23 = vld [vmem:[%s5642_s0 + $0x30] sm:$0xff]  ;;  %v920_v24 = vld [vmem:[%s5642_s0 + $0x38] sm:$0xff]  ;;  %v921_v29 = vld [vmem:[%s5642_s0 + $0x40] sm:$0xff] }
  0x41   : > { %4469 = vmatpush3.bf16.msra.mxu1 %v4468_v9  ;;  %v4477_v26 = vpack.c.bf16 %v920_v24, %v919_v23  ;;  %v922_v30 = vld [vmem:[%s5642_s0 + $0x48] sm:$0xff]  ;;  %v923_v35 = vld [vmem:[%s5642_s0 + $0x50] sm:$0xff]  ;;  %v924_v36 = vld [vmem:[%s5642_s0 + $0x58] sm:$0xff] }
  0x42   : > { %4470 = vmatprep.subr.bf16.mxu1 %v4856_v4  ;;  %v4480_v32 = vpack.c.bf16 %v922_v30, %v921_v29  ;;  %v4483_v38 = vpack.c.bf16 %v924_v36, %v923_v35  ;;  %v925_v41 = vld [vmem:[%s5642_s0 + $0x60] sm:$0xff]  ;;  %v926_v42 = vld [vmem:[%s5642_s0 + $0x68] sm:$0xff]  ;;  %v927_v47 = vld [vmem:[%s5642_s0 + $0x70] sm:$0xff] }
  0x43   : > { %4451 = vmatpush3.bf16.msra.mxu0 %v4450_v19  ;;  %v4486_v44 = vpack.c.bf16 %v926_v42, %v925_v41  ;;  %v928_v48 = vld [vmem:[%s5642_s0 + $0x78] sm:$0xff]  ;;  %v1007_v51 = vld [vmem:[%s5643_s12] sm:$0xff]  ;;  %v1008_v52 = vld [vmem:[%s5643_s12 + $0x8] sm:$0xff] }
  0x44   : > { %4452 = vmatprep.subr.bf16.mxu0 %v4856_v4  ;;  %v4489_v50 = vpack.c.bf16 %v928_v48, %v927_v47  ;;  %v5106_v55 = vld [vmem:[#allocation6] sm:$0xff]  ;;  %v4492_v56 = vpack.c.bf16 %v1008_v52, %v1007_v51  ;;  %v1009_v58 = vld [vmem:[%s5643_s12 + $0x10] sm:$0xff]  ;;  %v1010_v59 = vld [vmem:[%s5643_s12 + $0x18] sm:$0xff] }
  0x45   : > { %4472 = vmatpush3.bf16.msra.mxu1 %v4471_v14  ;;  %v3435_v60 = vld [vmem:[%s4974_s21 + $0x90] sm:$0xff]  ;;  %v3436_v61 = vld [vmem:[%s4974_s21 + $0x98] sm:$0xff]  ;;  %v4495_v62 = vpack.c.bf16 %v1010_v59, %v1009_v58  ;;  %v1011_v0 = vld [vmem:[%s5643_s12 + $0x20] sm:$0xff] }
  0x46   : > { %4473 = vmatprep.subr.bf16.mxu1 %v4856_v4  ;;  %v4519_v63 = vpack.c.bf16 %v3436_v61, %v3435_v60  ;;  %v1012_v1 = vld [vmem:[%s5643_s12 + $0x28] sm:$0xff]  ;;  %v3437_v2 = vld [vmem:[%s4974_s21 + $0xa0] sm:$0xff]  ;;  %v1013_v7 = vld [vmem:[%s5643_s12 + $0x30] sm:$0xff] }
  0x47   : > { %4454 = vmatpush3.bf16.msra.mxu0 %v4453_v25  ;;  %v3438_v3 = vld [vmem:[%s4974_s21 + $0xa8] sm:$0xff]  ;;  %v4498_v5 = vpack.c.bf16 %v1012_v1, %v1011_v0  ;;  %v1014_v8 = vld [vmem:[%s5643_s12 + $0x38] sm:$0xff]  ;;  %v3439_v9 = vld [vmem:[%s4974_s21 + $0xb0] sm:$0xff] }
  0x48   : > { %4455 = vmatprep.subr.bf16.mxu0 %v4856_v4  ;;  %v4522_v6 = vpack.c.bf16 %v3438_v3, %v3437_v2  ;;  %v3440_v10 = vld [vmem:[%s4974_s21 + $0xb8] sm:$0xff]  ;;  %v4501_v11 = vpack.c.bf16 %v1014_v8, %v1013_v7  ;;  %v1015_v14 = vld [vmem:[%s5643_s12 + $0x40] sm:$0xff]  ;;  %v1016_v15 = vld [vmem:[%s5643_s12 + $0x48] sm:$0xff] }
  0x49   : > { %4475 = vmatpush3.bf16.msra.mxu1 %v4474_v20  ;;  %v4525_v13 = vpack.c.bf16 %v3440_v10, %v3439_v9  ;;  %v3441_v16 = vld [vmem:[%s4974_s21 + $0xc0] sm:$0xff]  ;;  %v3442_v17 = vld [vmem:[%s4974_s21 + $0xc8] sm:$0xff]  ;;  %v4504_v18 = vpack.c.bf16 %v1016_v15, %v1015_v14  ;;  %v1017_v20 = vld [vmem:[%s5643_s12 + $0x50] sm:$0xff] }
  0x4a   : > { %4476 = vmatprep.subr.bf16.mxu1 %v4856_v4  ;;  %v4528_v19 = vpack.c.bf16 %v3442_v17, %v3441_v16  ;;  %v1018_v21 = vld [vmem:[%s5643_s12 + $0x58] sm:$0xff]  ;;  %v3443_v22 = vld [vmem:[%s4974_s21 + $0xd0] sm:$0xff]  ;;  %v1020_v27 = vld [vmem:[%s5643_s12 + $0x68] sm:$0xff] }
  0x4b   : > { %4457 = vmatpush3.bf16.msra.mxu0 %v4456_v31  ;;  %v3444_v23 = vld [vmem:[%s4974_s21 + $0xd8] sm:$0xff]  ;;  %v4507_v24 = vpack.c.bf16 %v1018_v21, %v1017_v20  ;;  %v3445_v28 = vld [vmem:[%s4974_s21 + $0xe0] sm:$0xff]  ;;  %v3446_v29 = vld [vmem:[%s4974_s21 + $0xe8] sm:$0xff] }
  0x4c   : > { %4458 = vmatprep.subr.bf16.mxu0 %v4856_v4  ;;  %v4531_v25 = vpack.c.bf16 %v3444_v23, %v3443_v22  ;;  %v4534_v31 = vpack.c.bf16 %v3446_v29, %v3445_v28  ;;  %v1022_v33 = vld [vmem:[%s5643_s12 + $0x78] sm:$0xff]  ;;  %v3447_v34 = vld [vmem:[%s4974_s21 + $0xf0] sm:$0xff]  ;;  %v3452_v39 = vld [vmem:[%s5642_s0 + $0x88] sm:$0xff] }
  0x4d   : > { %4478 = vmatpush3.bf16.msra.mxu1 %v4477_v26  ;;  %v1019_v26 = vld [vmem:[%s5643_s12 + $0x60] sm:$0xff]  ;;  %v3448_v35 = vld [vmem:[%s4974_s21 + $0xf8] sm:$0xff]  ;;  %v3470_v41 = vld [vmem:[%s5643_s12 + $0x88] sm:$0xff] }
  0x4e   : > { %4479 = vmatprep.subr.bf16.mxu1 %v4856_v4  ;;  %v4510_v30 = vpack.c.bf16 %v1020_v27, %v1019_v26  ;;  %v3469_v40 = vld [vmem:[%s5643_s12 + $0x80] sm:$0xff]  ;;  %v3454_v45 = vld [vmem:[%s5642_s0 + $0x98] sm:$0xff]  ;;  %v3471_v46 = vld [vmem:[%s5643_s12 + $0x90] sm:$0xff] }
  0x4f   : > { %4460 = vmatpush3.bf16.msra.mxu0 %v4459_v37  ;;  %v4537_v37 = vpack.c.bf16 %v3448_v35, %v3447_v34  ;;  %v3472_v47 = vld [vmem:[%s5643_s12 + $0x98] sm:$0xff]  ;;  %v3456_v51 = vld [vmem:[%s5642_s0 + $0xa8] sm:$0xff]  ;;  %v3473_v52 = vld [vmem:[%s5643_s12 + $0xa0] sm:$0xff] }
  0x50   : > { %4461 = vmatprep.subr.bf16.mxu0 %v4856_v4  ;;  %v3474_v53 = vld [vmem:[%s5643_s12 + $0xa8] sm:$0xff]  ;;  %v3458_v58 = vld [vmem:[%s5642_s0 + $0xb8] sm:$0xff]  ;;  %v3475_v59 = vld [vmem:[%s5643_s12 + $0xb0] sm:$0xff] }
  0x51   : > { %4481 = vmatpush3.bf16.msra.mxu1 %v4480_v32  ;;  %v1021_v32 = vld [vmem:[%s5643_s12 + $0x70] sm:$0xff]  ;;  %v3476_v60 = vld [vmem:[%s5643_s12 + $0xb8] sm:$0xff]  ;;  %v3460_v0 = vld [vmem:[%s5642_s0 + $0xc8] sm:$0xff] }
  0x52   : > { %4482 = vmatprep.subr.bf16.mxu1 %v4856_v4  ;;  %v4513_v36 = vpack.c.bf16 %v1022_v33, %v1021_v32  ;;  %v3477_v1 = vld [vmem:[%s5643_s12 + $0xc0] sm:$0xff]  ;;  %v3478_v2 = vld [vmem:[%s5643_s12 + $0xc8] sm:$0xff]  ;;  %v3462_v7 = vld [vmem:[%s5642_s0 + $0xd8] sm:$0xff] }
  0x53   : > { %4463 = vmatpush3.bf16.msra.mxu0 %v4462_v43  ;;  %v4564_v43 = vpack.c.bf16 %v3470_v41, %v3469_v40  ;;  %v3479_v8 = vld [vmem:[%s5643_s12 + $0xd0] sm:$0xff]  ;;  %v3480_v9 = vld [vmem:[%s5643_s12 + $0xd8] sm:$0xff]  ;;  %v3464_v14 = vld [vmem:[%s5642_s0 + $0xe8] sm:$0xff] }
  0x54   : > { %4464 = vmatprep.subr.bf16.mxu0 %v4856_v4  ;;  %v3481_v15 = vld [vmem:[%s5643_s12 + $0xe0] sm:$0xff]  ;;  %v3482_v16 = vld [vmem:[%s5643_s12 + $0xe8] sm:$0xff]  ;;  %v3466_v20 = vld [vmem:[%s5642_s0 + $0xf8] sm:$0xff] }
  0x55   : > { %4484 = vmatpush3.bf16.msra.mxu1 %v4483_v38  ;;  %v3451_v38 = vld [vmem:[%s5642_s0 + $0x80] sm:$0xff]  ;;  %v3483_v21 = vld [vmem:[%s5643_s12 + $0xf0] sm:$0xff]  ;;  %v3484_v22 = vld [vmem:[%s5643_s12 + $0xf8] sm:$0xff] }
  0x56   : > { %4485 = vmatprep.subr.bf16.mxu1 %v4856_v4  ;;  %v4540_v42 = vpack.c.bf16 %v3452_v39, %v3451_v38  ;;  %v3488_v26 = vld [vmem:[%s4974_s21 + $0x108] sm:$0xff]  ;;  %v3505_v27 = vld [vmem:[%s5642_s0 + $0x100] sm:$0xff]  ;;  %v3490_v32 = vld [vmem:[%s4974_s21 + $0x118] sm:$0xff] }
  0x57   : > { %4466 = vmatpush3.bf16.msra.mxu0 %v4465_v49  ;;  %v4567_v49 = vpack.c.bf16 %v3472_v47, %v3471_v46  ;;  %v3506_v28 = vld [vmem:[%s5642_s0 + $0x108] sm:$0xff]  ;;  %v3507_v33 = vld [vmem:[%s5642_s0 + $0x110] sm:$0xff]  ;;  %v3508_v34 = vld [vmem:[%s5642_s0 + $0x118] sm:$0xff] }
  0x58   : > { %4491 = vmatprep.subr.bf16.mxu0 %v4856_v4  ;;  %v3492_v38 = vld [vmem:[%s4974_s21 + $0x128] sm:$0xff]  ;;  %v3509_v39 = vld [vmem:[%s5642_s0 + $0x120] sm:$0xff]  ;;  %v3512_v46 = vld [vmem:[%s5642_s0 + $0x138] sm:$0xff] }
  0x59   : > { %4487 = vmatpush3.bf16.msra.mxu1 %v4486_v44  ;;  %v3453_v44 = vld [vmem:[%s5642_s0 + $0x90] sm:$0xff]  ;;  %v3510_v40 = vld [vmem:[%s5642_s0 + $0x128] sm:$0xff] }
  0x5a   : > { %4488 = vmatprep.subr.bf16.mxu1 %v4856_v4  ;;  %3926 = vmatmul.mubr.f32.vlgmr.msra.gmra.mrb[0].mxu0 %v5106_v55  ;;  %v4543_v48 = vpack.c.bf16 %v3454_v45, %v3453_v44  ;;  %v3494_v44 = vld [vmem:[%s4974_s21 + $0x138] sm:$0xff]  ;;  %v3511_v45 = vld [vmem:[%s5642_s0 + $0x130] sm:$0xff] }
  0x5b   : > { %4493 = vmatpush3.bf16.msra.mxu0 %v4492_v56  ;;  %3995 = vmatprep.mubr.msk.f32.mxu0 %vm4857_vm0, %v4858_v12  ;;  %v4570_v56 = vpack.c.bf16 %v3474_v53, %v3473_v52  ;;  %v3514_v52 = vld [vmem:[%s5642_s0 + $0x148] sm:$0xff] }
  0x5c   : > { %4494 = vmatprep.subr.bf16.mxu0 %v4856_v4 }
  0x5d   : > { %4490 = vmatpush3.bf16.msra.mxu1 %v4489_v50  ;;  %v3455_v50 = vld [vmem:[%s5642_s0 + $0xa0] sm:$0xff] }
  0x5e   : > { %4515 = vmatprep.subr.bf16.mxu1 %v4856_v4  ;;  %v4546_v54 = vpack.c.bf16 %v3456_v51, %v3455_v50  ;;  %v3496_v50 = vld [vmem:[%s4974_s21 + $0x148] sm:$0xff]  ;;  %v3513_v51 = vld [vmem:[%s5642_s0 + $0x140] sm:$0xff] }
  0x5f   : > { %4496 = vmatpush3.bf16.msra.mxu0 %v4495_v62  ;;  %v4573_v62 = vpack.c.bf16 %v3476_v60, %v3475_v59  ;;  %v3516_v59 = vld [vmem:[%s5642_s0 + $0x158] sm:$0xff] }
  0x60   : > { %3961 = vmatmul.mubr.f32.vlgmr.msra.gmra.mrb[0].mxu1 %v5106_v55  ;;  %4497 = vmatprep.subr.bf16.mxu0 %v4856_v4 }
  0x61   : > { %4517 = vmatpush3.bf16.msra.mxu1 %v4516_v57  ;;  %4030 = vmatprep.mubr.msk.f32.mxu1 %vm4857_vm0, %v4858_v12  ;;  %v3457_v57 = vld [vmem:[%s5642_s0 + $0xb0] sm:$0xff] }
  0x62   : > { %4518 = vmatprep.subr.bf16.mxu1 %v4856_v4  ;;  %v4549_v61 = vpack.c.bf16 %v3458_v58, %v3457_v57  ;;  %v3498_v57 = vld [vmem:[%s4974_s21 + $0x158] sm:$0xff]  ;;  %v3515_v58 = vld [vmem:[%s5642_s0 + $0x150] sm:$0xff] }
  0x63   : > { %4499 = vmatpush3.bf16.msra.mxu0 %v4498_v5  ;;  %v4576_v5 = vpack.c.bf16 %v3478_v2, %v3477_v1  ;;  %v3518_v1 = vld [vmem:[%s5642_s0 + $0x168] sm:$0xff] }
  0x64   : > { %4500 = vmatprep.subr.bf16.mxu0 %v4856_v4 }
  0x65   : > { %4520 = vmatpush3.bf16.msra.mxu1 %v4519_v63  ;;  %v3459_v63 = vld [vmem:[%s5642_s0 + $0xc0] sm:$0xff] }
  0x66   : > { %4521 = vmatprep.subr.bf16.mxu1 %v4856_v4  ;;  %v4552_v3 = vpack.c.bf16 %v3460_v0, %v3459_v63  ;;  %v3500_v63 = vld [vmem:[%s4974_s21 + $0x168] sm:$0xff]  ;;  %v3517_v0 = vld [vmem:[%s5642_s0 + $0x160] sm:$0xff] }
  0x67   : > { %4502 = vmatpush3.bf16.msra.mxu0 %v4501_v11  ;;  %v4579_v11 = vpack.c.bf16 %v3480_v9, %v3479_v8  ;;  %v3520_v8 = vld [vmem:[%s5642_s0 + $0x178] sm:$0xff] }
  0x68   : > { %4503 = vmatprep.subr.bf16.mxu0 %v4856_v4 }
  0x69   : > { %4523 = vmatpush3.bf16.msra.mxu1 %v4522_v6  ;;  %v3461_v6 = vld [vmem:[%s5642_s0 + $0xd0] sm:$0xff] }
  0x6a   : > { %4524 = vmatprep.subr.bf16.mxu1 %v4856_v4  ;;  %v4555_v10 = vpack.c.bf16 %v3462_v7, %v3461_v6  ;;  %v3502_v6 = vld [vmem:[%s4974_s21 + $0x178] sm:$0xff]  ;;  %v3519_v7 = vld [vmem:[%s5642_s0 + $0x170] sm:$0xff] }
  0x6b   : > { %4505 = vmatpush3.bf16.msra.mxu0 %v4504_v18  ;;  %v4582_v18 = vpack.c.bf16 %v3482_v16, %v3481_v15  ;;  %v3542_v15 = vld [vmem:[%s4974_s21 + $0x188] sm:$0xff] }
  0x6c   : > { %4506 = vmatprep.subr.bf16.mxu0 %v4856_v4 }
  0x6d   : > { %4526 = vmatpush3.bf16.msra.mxu1 %v4525_v13  ;;  %v3463_v13 = vld [vmem:[%s5642_s0 + $0xe0] sm:$0xff] }
  0x6e   : > { %4527 = vmatprep.subr.bf16.mxu1 %v4856_v4  ;;  %v4558_v17 = vpack.c.bf16 %v3464_v14, %v3463_v13  ;;  %v3524_v13 = vld [vmem:[%s5643_s12 + $0x108] sm:$0xff]  ;;  %v3541_v14 = vld [vmem:[%s4974_s21 + $0x180] sm:$0xff] }
  0x6f   : > { %4508 = vmatpush3.bf16.msra.mxu0 %v4507_v24  ;;  %v4585_v24 = vpack.c.bf16 %v3484_v22, %v3483_v21  ;;  %v3544_v21 = vld [vmem:[%s4974_s21 + $0x198] sm:$0xff] }
  0x70   : > { %4509 = vmatprep.subr.bf16.mxu0 %v4856_v4 }
  0x71   : > { %4529 = vmatpush3.bf16.msra.mxu1 %v4528_v19  ;;  %v3465_v19 = vld [vmem:[%s5642_s0 + $0xf0] sm:$0xff] }
  0x72   : > { %4530 = vmatprep.subr.bf16.mxu1 %v4856_v4  ;;  %v4561_v23 = vpack.c.bf16 %v3466_v20, %v3465_v19  ;;  %v4660_v19 = vpack.c.bf16 %v3542_v15, %v3541_v14  ;;  %v3543_v20 = vld [vmem:[%s4974_s21 + $0x190] sm:$0xff]  ;;  %v3582_v14 = vld [vmem:[%s5643_s12 + $0x1a8] sm:$0xff] }
  0x73   : > { %4511 = vmatpush3.bf16.msra.mxu0 %v4510_v30  ;;  %v4612_v30 = vpack.c.bf16 %v3506_v28, %v3505_v27  ;;  %v3546_v27 = vld [vmem:[%s4974_s21 + $0x1a8] sm:$0xff] }
  0x74   : > { %4512 = vmatprep.subr.bf16.mxu0 %v4856_v4 }
  0x75   : > { %4532 = vmatpush3.bf16.msra.mxu1 %v4531_v25  ;;  %v3487_v25 = vld [vmem:[%s4974_s21 + $0x100] sm:$0xff] }
  0x76   : > { %4533 = vmatprep.subr.bf16.mxu1 %v4856_v4  ;;  %v4588_v29 = vpack.c.bf16 %v3488_v26, %v3487_v25  ;;  %v4663_v25 = vpack.c.bf16 %v3544_v21, %v3543_v20  ;;  %v3545_v26 = vld [vmem:[%s4974_s21 + $0x1a0] sm:$0xff]  ;;  %v3584_v20 = vld [vmem:[%s5643_s12 + $0x1b8] sm:$0xff] }
  0x77   : > { %4514 = vmatpush3.bf16.msra.mxu0 %v4513_v36  ;;  %v4615_v36 = vpack.c.bf16 %v3508_v34, %v3507_v33  ;;  %v3548_v33 = vld [vmem:[%s4974_s21 + $0x1b8] sm:$0xff] }
  0x78   : > { %4539 = vmatprep.subr.bf16.mxu0 %v4856_v4 }
  0x79   : > { %4535 = vmatpush3.bf16.msra.mxu1 %v4534_v31  ;;  %v3489_v31 = vld [vmem:[%s4974_s21 + $0x110] sm:$0xff] }
  0x7a   : > { %4536 = vmatprep.subr.bf16.mxu1 %v4856_v4  ;;  %3996 = vmatmul.mubr.f32.vlgmr.msra.gmra.mrb[2].mxu0 %v5106_v55  ;;  %v4591_v35 = vpack.c.bf16 %v3490_v32, %v3489_v31  ;;  %v4666_v31 = vpack.c.bf16 %v3546_v27, %v3545_v26  ;;  %v3547_v32 = vld [vmem:[%s4974_s21 + $0x1b0] sm:$0xff]  ;;  %v3586_v26 = vld [vmem:[%s5643_s12 + $0x1c8] sm:$0xff] }
  0x7b   : > { %4541 = vmatpush3.bf16.msra.mxu0 %v4540_v42  ;;  %4065 = vmatprep.mubr.msk.f32.mxu0 %vm4857_vm0, %v4858_v12  ;;  %v4618_v42 = vpack.c.bf16 %v3510_v40, %v3509_v39  ;;  %v3550_v39 = vld [vmem:[%s4974_s21 + $0x1c8] sm:$0xff] }
  0x7c   : > { %4542 = vmatprep.subr.bf16.mxu0 %v4856_v4 }
  0x7d   : > { %4538 = vmatpush3.bf16.msra.mxu1 %v4537_v37  ;;  %v3491_v37 = vld [vmem:[%s4974_s21 + $0x120] sm:$0xff] }
  0x7e   : > { %4563 = vmatprep.subr.bf16.mxu1 %v4856_v4  ;;  %v4594_v41 = vpack.c.bf16 %v3492_v38, %v3491_v37  ;;  %v4669_v37 = vpack.c.bf16 %v3548_v33, %v3547_v32  ;;  %v3549_v38 = vld [vmem:[%s4974_s21 + $0x1c0] sm:$0xff]  ;;  %v3588_v32 = vld [vmem:[%s5643_s12 + $0x1d8] sm:$0xff] }
  0x7f   : > { %4544 = vmatpush3.bf16.msra.mxu0 %v4543_v48  ;;  %v4621_v48 = vpack.c.bf16 %v3512_v46, %v3511_v45  ;;  %v3552_v45 = vld [vmem:[%s4974_s21 + $0x1d8] sm:$0xff] }
  0x80   : > { %4031 = vmatmul.mubr.f32.vlgmr.msra.gmra.mrb[2].mxu1 %v5106_v55  ;;  %4545 = vmatprep.subr.bf16.mxu0 %v4856_v4 }
  0x81   : > { %4565 = vmatpush3.bf16.msra.mxu1 %v4564_v43  ;;  %4100 = vmatprep.mubr.msk.f32.mxu1 %vm4857_vm0, %v4858_v12  ;;  %v3493_v43 = vld [vmem:[%s4974_s21 + $0x130] sm:$0xff] }
  0x82   : > { %4566 = vmatprep.subr.bf16.mxu1 %v4856_v4  ;;  %v4597_v47 = vpack.c.bf16 %v3494_v44, %v3493_v43  ;;  %v4672_v43 = vpack.c.bf16 %v3550_v39, %v3549_v38  ;;  %v3551_v44 = vld [vmem:[%s4974_s21 + $0x1d0] sm:$0xff]  ;;  %v3590_v38 = vld [vmem:[%s5643_s12 + $0x1e8] sm:$0xff] }
  0x83   : > { %4547 = vmatpush3.bf16.msra.mxu0 %v4546_v54  ;;  %v4624_v54 = vpack.c.bf16 %v3514_v52, %v3513_v51  ;;  %v3554_v51 = vld [vmem:[%s4974_s21 + $0x1e8] sm:$0xff] }
  0x84   : > { %4548 = vmatprep.subr.bf16.mxu0 %v4856_v4 }
  0x85   : > { %4568 = vmatpush3.bf16.msra.mxu1 %v4567_v49  ;;  %v3495_v49 = vld [vmem:[%s4974_s21 + $0x140] sm:$0xff] }
  0x86   : > { %4569 = vmatprep.subr.bf16.mxu1 %v4856_v4  ;;  %v4600_v53 = vpack.c.bf16 %v3496_v50, %v3495_v49  ;;  %v4675_v49 = vpack.c.bf16 %v3552_v45, %v3551_v44  ;;  %v3553_v50 = vld [vmem:[%s4974_s21 + $0x1e0] sm:$0xff]  ;;  %v3592_v44 = vld [vmem:[%s5643_s12 + $0x1f8] sm:$0xff] }
  0x87   : > { %4550 = vmatpush3.bf16.msra.mxu0 %v4549_v61  ;;  %v4627_v61 = vpack.c.bf16 %v3516_v59, %v3515_v58  ;;  %v3556_v58 = vld [vmem:[%s4974_s21 + $0x1f8] sm:$0xff] }
  0x88   : > { %4551 = vmatprep.subr.bf16.mxu0 %v4856_v4 }
  0x89   : > { %4571 = vmatpush3.bf16.msra.mxu1 %v4570_v56  ;;  %v3497_v56 = vld [vmem:[%s4974_s21 + $0x150] sm:$0xff] }
  0x8a   : > { %4572 = vmatprep.subr.bf16.mxu1 %v4856_v4  ;;  %v4603_v60 = vpack.c.bf16 %v3498_v57, %v3497_v56  ;;  %v4678_v56 = vpack.c.bf16 %v3554_v51, %v3553_v50  ;;  %v3555_v57 = vld [vmem:[%s4974_s21 + $0x1f0] sm:$0xff] }
  0x8b   : > { %4553 = vmatpush3.bf16.msra.mxu0 %v4552_v3  ;;  %v4630_v3 = vpack.c.bf16 %v3518_v1, %v3517_v0  ;;  %v3578_v0 = vld [vmem:[%s5643_s12 + $0x188] sm:$0xff] }
  0x8c   : > { %4554 = vmatprep.subr.bf16.mxu0 %v4856_v4 }
  0x8d   : > { %4574 = vmatpush3.bf16.msra.mxu1 %v4573_v62  ;;  %v3499_v62 = vld [vmem:[%s4974_s21 + $0x160] sm:$0xff] }
  0x8e   : > { %4575 = vmatprep.subr.bf16.mxu1 %v4856_v4  ;;  %v4606_v2 = vpack.c.bf16 %v3500_v63, %v3499_v62  ;;  %v4681_v62 = vpack.c.bf16 %v3556_v58, %v3555_v57  ;;  %v3577_v63 = vld [vmem:[%s5643_s12 + $0x180] sm:$0xff] }
  0x8f   : > { %4556 = vmatpush3.bf16.msra.mxu0 %v4555_v10  ;;  %v4633_v10 = vpack.c.bf16 %v3520_v8, %v3519_v7  ;;  %v3580_v7 = vld [vmem:[%s5643_s12 + $0x198] sm:$0xff]  ;;  %v3450_v58 = vld [vmem:[%s4989_s28 + $0x1] ss:$0 sm:$0xff] }
  0x90   : > { %4557 = vmatprep.subr.bf16.mxu0 %v4856_v4 }
  0x91   : > { %4577 = vmatpush3.bf16.msra.mxu1 %v4576_v5  ;;  %v3501_v5 = vld [vmem:[%s4974_s21 + $0x170] sm:$0xff]  ;;  %s5644_s21 = sld [smem:[#allocation13_spill]] }
  0x92   : > { %4578 = vmatprep.subr.bf16.mxu1 %v4856_v4  ;;  %v4609_v9 = vpack.c.bf16 %v3502_v6, %v3501_v5  ;;  %v4708_v5 = vpack.c.bf16 %v3578_v0, %v3577_v63  ;;  %v3579_v6 = vld [vmem:[%s5643_s12 + $0x190] sm:$0xff] }
  0x93   : > { %4559 = vmatpush3.bf16.msra.mxu0 %v4558_v17  ;;  %v3525_v17 = vld [vmem:[%s5643_s12 + $0x110] sm:$0xff] }
  0x94   : > { %4560 = vmatprep.subr.bf16.mxu0 %v4856_v4 }
  0x95   : > { %4580 = vmatpush3.bf16.msra.mxu1 %v4579_v11  ;;  %v3523_v11 = vld [vmem:[%s5643_s12 + $0x100] sm:$0xff] }
  0x96   : > { %4581 = vmatprep.subr.bf16.mxu1 %v4856_v4  ;;  %v4636_v16 = vpack.c.bf16 %v3524_v13, %v3523_v11  ;;  %v4711_v11 = vpack.c.bf16 %v3580_v7, %v3579_v6  ;;  %v3581_v13 = vld [vmem:[%s5643_s12 + $0x1a0] sm:$0xff] }
  0x97   : > { %4562 = vmatpush3.bf16.msra.mxu0 %v4561_v23  ;;  %v3527_v23 = vld [vmem:[%s5643_s12 + $0x120] sm:$0xff] }
  0x98   : > { %4587 = vmatprep.subr.bf16.mxu0 %v4856_v4  ;;  %v3432_v57 = vld [vmem:[%s5644_s21] ss:$0 sm:$0xff] }
  0x99   : > { %4583 = vmatpush3.bf16.msra.mxu1 %v4582_v18  ;;  %v3526_v18 = vld [vmem:[%s5643_s12 + $0x118] sm:$0xff] }
  0x9a   : > { %4584 = vmatprep.subr.bf16.mxu1 %v4856_v4  ;;  %4066 = vmatmul.mubr.f32.vlgmr.msra.gmra.mrb[4].mxu0 %v5106_v55  ;;  %v4639_v22 = vpack.c.bf16 %v3526_v18, %v3525_v17  ;;  %v3566_v17 = vld [vmem:[%s5642_s0 + $0x1b8] sm:$0xff]  ;;  %v4714_v18 = vpack.c.bf16 %v3582_v14, %v3581_v13  ;;  %v3504_v13 = vld [vmem:[%s4989_s28 + $0x2] ss:$0 sm:$0xff] }
  0x9b   : > { %4589 = vmatpush3.bf16.msra.mxu0 %v4588_v29  ;;  %4135 = vmatprep.mubr.msk.f32.mxu0 %vm4857_vm0, %v4858_v12  ;;  %v3529_v29 = vld [vmem:[%s5643_s12 + $0x130] sm:$0xff]  ;;  %v3522_v14 = vld [vmem:[%s4994_s20 + $0x2] ss:$0 sm:$0xff] }
  0x9c   : > { %4590 = vmatprep.subr.bf16.mxu0 %v4856_v4 }
  0x9d   : > { %4586 = vmatpush3.bf16.msra.mxu1 %v4585_v24  ;;  %v3528_v24 = vld [vmem:[%s5643_s12 + $0x128] sm:$0xff] }
  0x9e   : > { %4611 = vmatprep.subr.bf16.mxu1 %v4856_v4  ;;  %v4642_v28 = vpack.c.bf16 %v3528_v24, %v3527_v23  ;;  %v3568_v23 = vld [vmem:[%s5642_s0 + $0x1c8] sm:$0xff] }
  0x9f   : > { %4592 = vmatpush3.bf16.msra.mxu0 %v4591_v35  ;;  %v3531_v35 = vld [vmem:[%s5643_s12 + $0x140] sm:$0xff] }
  0xa0   : > { %4101 = vmatmul.mubr.f32.vlgmr.msra.gmra.mrb[4].mxu1 %v5106_v55  ;;  %4593 = vmatprep.subr.bf16.mxu0 %v4856_v4 }
  0xa1   : > { %4613 = vmatpush3.bf16.msra.mxu1 %v4612_v30  ;;  %4170 = vmatprep.mubr.msk.f32.mxu1 %vm4857_vm0, %v4858_v12  ;;  %v3530_v30 = vld [vmem:[%s5643_s12 + $0x138] sm:$0xff] }
  0xa2   : > { %4614 = vmatprep.subr.bf16.mxu1 %v4856_v4  ;;  %v4645_v34 = vpack.c.bf16 %v3530_v30, %v3529_v29  ;;  %v3570_v29 = vld [vmem:[%s5642_s0 + $0x1d8] sm:$0xff] }
  0xa3   : > { %4595 = vmatpush3.bf16.msra.mxu0 %v4594_v41  ;;  %v3533_v41 = vld [vmem:[%s5643_s12 + $0x150] sm:$0xff] }
  0xa4   : > { %4596 = vmatprep.subr.bf16.mxu0 %v4856_v4 }
  0xa5   : > { %4616 = vmatpush3.bf16.msra.mxu1 %v4615_v36  ;;  %v3532_v36 = vld [vmem:[%s5643_s12 + $0x148] sm:$0xff] }
  0xa6   : > { %4617 = vmatprep.subr.bf16.mxu1 %v4856_v4  ;;  %v4648_v40 = vpack.c.bf16 %v3532_v36, %v3531_v35  ;;  %v3572_v35 = vld [vmem:[%s5642_s0 + $0x1e8] sm:$0xff] }
  0xa7   : > { %4598 = vmatpush3.bf16.msra.mxu0 %v4597_v47  ;;  %v3535_v47 = vld [vmem:[%s5643_s12 + $0x160] sm:$0xff] }
  0xa8   : > { %4599 = vmatprep.subr.bf16.mxu0 %v4856_v4 }
  0xa9   : > { %4619 = vmatpush3.bf16.msra.mxu1 %v4618_v42  ;;  %v3534_v42 = vld [vmem:[%s5643_s12 + $0x158] sm:$0xff] }
  0xaa   : > { %4620 = vmatprep.subr.bf16.mxu1 %v4856_v4  ;;  %v4651_v46 = vpack.c.bf16 %v3534_v42, %v3533_v41  ;;  %v3574_v41 = vld [vmem:[%s5642_s0 + $0x1f8] sm:$0xff] }
  0xab   : > { %4601 = vmatpush3.bf16.msra.mxu0 %v4600_v53  ;;  %v3537_v53 = vld [vmem:[%s5643_s12 + $0x170] sm:$0xff] }
  0xac   : > { %4602 = vmatprep.subr.bf16.mxu0 %v4856_v4 }
  0xad   : > { %4622 = vmatpush3.bf16.msra.mxu1 %v4621_v48  ;;  %v3536_v48 = vld [vmem:[%s5643_s12 + $0x168] sm:$0xff] }
  0xae   : > { %4623 = vmatprep.subr.bf16.mxu1 %v4856_v4  ;;  %v4654_v52 = vpack.c.bf16 %v3536_v48, %v3535_v47  ;;  %v3430_v47 = vld [vmem:[%s4989_s28] ss:$0 sm:$0xff] }
  0xaf   : > { %4604 = vmatpush3.bf16.msra.mxu0 %v4603_v60  ;;  %v3559_v60 = vld [vmem:[%s5642_s0 + $0x180] sm:$0xff] }
  0xb0   : > { %4605 = vmatprep.subr.bf16.mxu0 %v4856_v4  ;;  %v3431_v48 = vld [vmem:[%s4994_s20] ss:$0 sm:$0xff] }
  0xb1   : > { %4625 = vmatpush3.bf16.msra.mxu1 %v4624_v54  ;;  %v3538_v54 = vld [vmem:[%s5643_s12 + $0x178] sm:$0xff] }
  0xb2   : > { %4626 = vmatprep.subr.bf16.mxu1 %v4856_v4  ;;  %v4657_v59 = vpack.c.bf16 %v3538_v54, %v3537_v53 }
  0xb3   : > { %4607 = vmatpush3.bf16.msra.mxu0 %v4606_v2  ;;  %v3561_v2 = vld [vmem:[%s5642_s0 + $0x190] sm:$0xff] }
  0xb4   : > { %4608 = vmatprep.subr.bf16.mxu0 %v4856_v4 }
  0xb5   : > { %4628 = vmatpush3.bf16.msra.mxu1 %v4627_v61  ;;  %v3560_v61 = vld [vmem:[%s5642_s0 + $0x188] sm:$0xff] }
  0xb6   : > { %4629 = vmatprep.subr.bf16.mxu1 %v4856_v4  ;;  %v4684_v1 = vpack.c.bf16 %v3560_v61, %v3559_v60 }
  0xb7   : > { %4610 = vmatpush3.bf16.msra.mxu0 %v4609_v9  ;;  %v3563_v9 = vld [vmem:[%s5642_s0 + $0x1a0] sm:$0xff] }
  0xb8   : > { %4635 = vmatprep.subr.bf16.mxu0 %v4856_v4 }
  0xb9   : > { %4631 = vmatpush3.bf16.msra.mxu1 %v4630_v3  ;;  %v3562_v3 = vld [vmem:[%s5642_s0 + $0x198] sm:$0xff] }
  0xba   : > { %4632 = vmatprep.subr.bf16.mxu1 %v4856_v4  ;;  %4136 = vmatmul.mubr.f32.vlgmr.msra.gmra.mrb[6].mxu0 %v5106_v55  ;;  %v4687_v8 = vpack.c.bf16 %v3562_v3, %v3561_v2  ;;  %v3486_v2 = vld [vmem:[%s5644_s21 + $0x1] ss:$0 sm:$0xff] }
  0xbb   : > { %4637 = vmatpush3.bf16.msra.mxu0 %v4636_v16  ;;  %4205 = vmatprep.mubr.msk.f32.mxu0 %vm4857_vm0, %v4858_v12  ;;  %v3565_v16 = vld [vmem:[%s5642_s0 + $0x1b0] sm:$0xff] }
  0xbc   : > { %4638 = vmatprep.subr.bf16.mxu0 %v4856_v4  ;;  %v4693_v21 = vpack.c.bf16 %v3566_v17, %v3565_v16 }
  0xbd   : > { %4634 = vmatpush3.bf16.msra.mxu1 %v4633_v10  ;;  %v3564_v10 = vld [vmem:[%s5642_s0 + $0x1a8] sm:$0xff] }
  0xbe   : > { %4659 = vmatprep.subr.bf16.mxu1 %v4856_v4  ;;  %v4690_v15 = vpack.c.bf16 %v3564_v10, %v3563_v9 }
  0xbf   : > { %4640 = vmatpush3.bf16.msra.mxu0 %v4639_v22  ;;  %v3567_v22 = vld [vmem:[%s5642_s0 + $0x1c0] sm:$0xff] }
  0xc0   : > { %4171 = vmatmul.mubr.f32.vlgmr.msra.gmra.mrb[6].mxu1 %v5106_v55  ;;  %4641 = vmatprep.subr.bf16.mxu0 %v4856_v4  ;;  %v4696_v27 = vpack.c.bf16 %v3568_v23, %v3567_v22 }
  0xc1   : > { %4661 = vmatpush3.bf16.msra.mxu1 %v4660_v19  ;;  %4240 = vmatprep.mubr.msk.f32.mxu1 %vm4857_vm0, %v4858_v12  ;;  %v3583_v19 = vld [vmem:[%s5643_s12 + $0x1b0] sm:$0xff] }
  0xc2   : > { %4662 = vmatprep.subr.bf16.mxu1 %v4856_v4  ;;  %v4717_v24 = vpack.c.bf16 %v3584_v20, %v3583_v19 }
  0xc3   : > { %4643 = vmatpush3.bf16.msra.mxu0 %v4642_v28  ;;  %v3569_v28 = vld [vmem:[%s5642_s0 + $0x1d0] sm:$0xff] }
  0xc4   : > { %4644 = vmatprep.subr.bf16.mxu0 %v4856_v4  ;;  %v4699_v33 = vpack.c.bf16 %v3570_v29, %v3569_v28 }
  0xc5   : > { %4664 = vmatpush3.bf16.msra.mxu1 %v4663_v25  ;;  %v3585_v25 = vld [vmem:[%s5643_s12 + $0x1c0] sm:$0xff] }
  0xc6   : > { %4665 = vmatprep.subr.bf16.mxu1 %v4856_v4  ;;  %v4720_v30 = vpack.c.bf16 %v3586_v26, %v3585_v25  ;;  %v3558_v26 = vld [vmem:[%s4989_s28 + $0x3] ss:$0 sm:$0xff] }
  0xc7   : > { %4646 = vmatpush3.bf16.msra.mxu0 %v4645_v34  ;;  %v3571_v34 = vld [vmem:[%s5642_s0 + $0x1e0] sm:$0xff] }
  0xc8   : > { %4647 = vmatprep.subr.bf16.mxu0 %v4856_v4  ;;  %v4702_v39 = vpack.c.bf16 %v3572_v35, %v3571_v34  ;;  %v3594_v34 = vld [vmem:[%s5644_s21 + $0x3] ss:$0 sm:$0xff] }
  0xc9   : > { %4667 = vmatpush3.bf16.msra.mxu1 %v4666_v31  ;;  %v3587_v31 = vld [vmem:[%s5643_s12 + $0x1d0] sm:$0xff] }
  0xca   : > { %4668 = vmatprep.subr.bf16.mxu1 %v4856_v4  ;;  %v4723_v36 = vpack.c.bf16 %v3588_v32, %v3587_v31  ;;  %v3576_v32 = vld [vmem:[%s4994_s20 + $0x3] ss:$0 sm:$0xff] }
  0xcb   : > { %4649 = vmatpush3.bf16.msra.mxu0 %v4648_v40  ;;  %v3573_v40 = vld [vmem:[%s5642_s0 + $0x1f0] sm:$0xff] }
  0xcc   : > { %4650 = vmatprep.subr.bf16.mxu0 %v4856_v4  ;;  %v4705_v45 = vpack.c.bf16 %v3574_v41, %v3573_v40 }
  0xcd   : > { %4670 = vmatpush3.bf16.msra.mxu1 %v4669_v37  ;;  %v3589_v37 = vld [vmem:[%s5643_s12 + $0x1e0] sm:$0xff] }
  0xce   : > { %4671 = vmatprep.subr.bf16.mxu1 %v4856_v4  ;;  %v4726_v42 = vpack.c.bf16 %v3590_v38, %v3589_v37 }
  0xcf   : > { %4652 = vmatpush3.bf16.msra.mxu0 %v4651_v46 }
  0xd0   : > { %4653 = vmatprep.subr.bf16.mxu0 %v4856_v4 }
  0xd1   : > { %4673 = vmatpush3.bf16.msra.mxu1 %v4672_v43  ;;  %v3591_v43 = vld [vmem:[%s5643_s12 + $0x1f0] sm:$0xff] }
  0xd2   : > { %4674 = vmatprep.subr.bf16.mxu1 %v4856_v4  ;;  %v4729_v46 = vpack.c.bf16 %v3592_v44, %v3591_v43  ;;  %v2290_v44 = vld [vmem:[%s5645_s22] sm:$0xff] }
  0xd3   : > { %4655 = vmatpush3.bf16.msra.mxu0 %v4654_v52 }
  0xd4   : > { %4656 = vmatprep.subr.bf16.mxu0 %v4856_v4 }
  0xd5   : > { %4676 = vmatpush3.bf16.msra.mxu1 %v4675_v49 }
  0xd6   : > { %4677 = vmatprep.subr.bf16.mxu1 %v4856_v4 }
  0xd7   : > { %4658 = vmatpush3.bf16.msra.mxu0 %v4657_v59 }
  0xd8   : > { %4683 = vmatprep.subr.bf16.mxu0 %v4856_v4 }
  0xd9   : > { %4679 = vmatpush3.bf16.msra.mxu1 %v4678_v56 }
  0xda   : > { %4680 = vmatprep.subr.bf16.mxu1 %v4856_v4  ;;  %4206 = vmatmul.mubr.f32.vlgmr.msra.gmra.mrb[8].mxu0 %v5106_v55 }
  0xdb   : > { %4685 = vmatpush3.bf16.msra.mxu0 %v4684_v1  ;;  %4275 = vmatprep.mubr.msk.f32.mxu0 %vm4857_vm0, %v4858_v12  ;;  %v3468_v1 = vld [vmem:[%s4994_s20 + $0x1] ss:$0 sm:$0xff]  ;;  %s4859_s20 = smov [#allocation6]  }
  0xdc   : > { %4686 = vmatprep.subr.bf16.mxu0 %v4856_v4  ;;  %s3212_s22 = sshll.u32 %s4859_s20, 4  ;;  %s3213_s22 = int_to_ptr.vmem [resolvable:$true] %s3212_s22 }
  0xdd   : > { %4682 = vmatpush3.bf16.msra.mxu1 %v4681_v62  ;;  %p4825_p9 = scmp.lt.s32.totalorder %s3213_s22, %s3213_s22 }
  0xde   : > { %4707 = vmatprep.subr.bf16.mxu1 %v4856_v4 }
  0xdf   : > { %4688 = vmatpush3.bf16.msra.mxu0 %v4687_v8 }
  0xe0   : > { %4241 = vmatmul.mubr.f32.vlgmr.msra.gmra.mrb[8].mxu1 %v5106_v55  ;;  %4689 = vmatprep.subr.bf16.mxu0 %v4856_v4 }
  0xe1   : > { %4709 = vmatpush3.bf16.msra.mxu1 %v4708_v5  ;;  %4310 = vmatprep.mubr.msk.f32.mxu1 %vm4857_vm0, %v4858_v12 }
  0xe2   : > { %4710 = vmatprep.subr.bf16.mxu1 %v4856_v4 }
  0xe3   : > { %4691 = vmatpush3.bf16.msra.mxu0 %v4690_v15 }
  0xe4   : > { %4692 = vmatprep.subr.bf16.mxu0 %v4856_v4 }
  0xe5   : > { %4712 = vmatpush3.bf16.msra.mxu1 %v4711_v11 }
  0xe6   : > { %4713 = vmatprep.subr.bf16.mxu1 %v4856_v4 }
  0xe7   : > { %4694 = vmatpush3.bf16.msra.mxu0 %v4693_v21 }
  0xe8   : > { %4695 = vmatprep.subr.bf16.mxu0 %v4856_v4 }
  0xe9   : > { %4715 = vmatpush3.bf16.msra.mxu1 %v4714_v18 }
  0xea   : > { %4716 = vmatprep.subr.bf16.mxu1 %v4856_v4 }
  0xeb   : > { %4697 = vmatpush3.bf16.msra.mxu0 %v4696_v27 }
  0xec   : > { %4698 = vmatprep.subr.bf16.mxu0 %v4856_v4 }
  0xed   : > { %4718 = vmatpush3.bf16.msra.mxu1 %v4717_v24  ;;  %v3540_v24 = vld [vmem:[%s5644_s21 + $0x2] ss:$0 sm:$0xff] }
  0xee   : > { %4719 = vmatprep.subr.bf16.mxu1 %v4856_v4 }
  0xef   : > { %4700 = vmatpush3.bf16.msra.mxu0 %v4699_v33 }
  0xf0   : > { %4701 = vmatprep.subr.bf16.mxu0 %v4856_v4 }
  0xf1   : > { %4721 = vmatpush3.bf16.msra.mxu1 %v4720_v30 }
  0xf2   : > { %4722 = vmatprep.subr.bf16.mxu1 %v4856_v4 }
  0xf3   : > { %4703 = vmatpush3.bf16.msra.mxu0 %v4702_v39 }
  0xf4   : > { %4704 = vmatprep.subr.bf16.mxu0 %v4856_v4 }
  0xf5   : > { %4724 = vmatpush3.bf16.msra.mxu1 %v4723_v36 }
  0xf6   : > { %4725 = vmatprep.subr.bf16.mxu1 %v4856_v4 }
  0xf7   : > { %4706 = vmatpush3.bf16.msra.mxu0 %v4705_v45 }
  0xf8   : > { %4313 = vmatprep.subr.mxu0 %v4858_v12 }
  0xf9   : > { %4727 = vmatpush3.bf16.msra.mxu1 %v4726_v42 }
  0xfa   : > { %4728 = vmatprep.subr.bf16.mxu1 %v4856_v4  ;;  %4276 = vmatmul.mubr.f32.vlgmr.msra.gmra.mrb[10].mxu0 %v5106_v55 }
  0xfb   : > { %4315 = vmatprep.mubr.msk.f32.mxu0 %vm4857_vm0, %v4858_v12 }
  0xfd   : > { %4730 = vmatpush3.bf16.msra.mxu1 %v4729_v46 }
  0xfe   : > { %4318 = vmatprep.subr.mxu1 %v4858_v12 }
 0x100   : > { %4311 = vmatmul.mubr.f32.vlgmr.msra.gmra.mrb[10].mxu1 %v5106_v55 }
 0x101   : > { %4320 = vmatprep.mubr.msk.f32.mxu1 %vm4857_vm0, %v4858_v12 }
 0x12d   : > { %v907_v49 = vpop.f32.mrb[0].mxu0 }
 0x12e   : > { %v908_v50 = vadd.f32 %v3430_v47, %v907_v49  ;;  %v3927_v52 = vpop.f32.mrb[1].mxu0 }
 0x130   : > { %912 = vst.msk [vmem:[#allocation2] sm:$0xff] %vm911_vm1, %v908_v50 }
 0x133   : > { %v1002_v51 = vpop.f32.mrb[0].mxu1 }
 0x134   : > { %v1003_v53 = vadd.f32 %v3431_v48, %v1002_v51  ;;  %v3962_v54 = vpop.f32.mrb[1].mxu1 }
 0x136   : > { %1006 = vst.msk [vmem:[#allocation3] sm:$0xff] %vm911_vm1, %v1003_v53 }
 0x137   : > { %v1974_v55 = vld [vmem:[#allocation2] sm:$0xff] }
 0x13d   : > { %v1978_v56 = vld [vmem:[#allocation3] sm:$0xff] }
 0x13e   : > { %4314 = vmatpush3.xpose.msk.msra.mxu0 %vm911_vm1, %v1978_v56 }
 0x13f   : > { %4323 = vmatprep.subr.mxu0 %v4858_v12 }
 0x141   : > { %4316 = vmatmul.mubr.msk.f32.vlgmr.msra.gmra.mrb[12].mxu0 %vm911_vm1, %v1974_v55 }
 0x142   : > { %4325 = vmatprep.mubr.msk.f32.mxu0 %vm4857_vm0, %v4858_v12 }
 0x14d   : > { %v1096_v59 = vpop.f32.mrb[2].mxu0 }
 0x14e   : > { %v1097_v60 = vadd.f32 %v3432_v57, %v1096_v59  ;;  %v3997_v61 = vpop.f32.mrb[3].mxu0 }
 0x150   : > { %1100 = vst.msk [vmem:[#allocation4] sm:$0xff] %vm911_vm1, %v1097_v60 }
 0x153   : > { %v1192_v62 = vpop.f32.mrb[2].mxu1 }
 0x154   : > { %v1193_v63 = vadd.f32 %v3450_v58, %v1192_v62  ;;  %v4032_v0 = vpop.f32.mrb[3].mxu1 }
 0x156   : > { %1197 = vst.msk [vmem:[#allocation2 + $0x8] sm:$0xff] %vm911_vm1, %v1193_v63 }
 0x157   : > { %v2339_v23 = vld [vmem:[#allocation4] sm:$0xff] }
 0x15d   : > { %v1975_v11 = vld [vmem:[#allocation2 + $0x8] sm:$0xff] }
 0x16d   : > { %v1289_v3 = vpop.f32.mrb[4].mxu0 }
 0x16e   : > { %v1290_v5 = vadd.f32 %v3468_v1, %v1289_v3  ;;  %v4067_v6 = vpop.f32.mrb[5].mxu0 }
 0x170   : > { %1294 = vst.msk [vmem:[#allocation3 + $0x8] sm:$0xff] %vm911_vm1, %v1290_v5 }
 0x173   : > { %v1386_v7 = vpop.f32.mrb[4].mxu1 }
 0x174   : > { %v1387_v8 = vadd.f32 %v3486_v2, %v1386_v7  ;;  %v4102_v9 = vpop.f32.mrb[5].mxu1 }
 0x176   : > { %1391 = vst.msk [vmem:[#allocation4 + $0x8] sm:$0xff] %vm911_vm1, %v1387_v8 }
 0x177   : > { %v1979_v10 = vld [vmem:[#allocation3 + $0x8] sm:$0xff] }
 0x178   : > { %4319 = vmatpush3.xpose.msk.msra.mxu1 %vm911_vm1, %v1979_v10 }
 0x179   : > { %4328 = vmatprep.subr.mxu1 %v4858_v12 }
 0x17b   : > { %4321 = vmatmul.mubr.msk.f32.vlgmr.msra.gmra.mrb[12].mxu1 %vm911_vm1, %v1975_v11 }
 0x17c   : > { %4330 = vmatprep.mubr.msk.f32.mxu1 %vm4857_vm0, %v4858_v12 }
 0x17d   : > { %v2340_v42 = vld [vmem:[#allocation4 + $0x8] sm:$0xff] }
 0x18d   : > { %v1483_v15 = vpop.f32.mrb[6].mxu0 }
 0x18e   : > { %v1484_v16 = vadd.f32 %v3504_v13, %v1483_v15  ;;  %v4137_v18 = vpop.f32.mrb[7].mxu0 }
 0x190   : > { %1488 = vst.msk [vmem:[#allocation2 + $0x10] sm:$0xff] %vm911_vm1, %v1484_v16 }
 0x193   : > { %v1580_v17 = vpop.f32.mrb[6].mxu1 }
 0x194   : > { %v1581_v19 = vadd.f32 %v3522_v14, %v1580_v17  ;;  %v4172_v20 = vpop.f32.mrb[7].mxu1 }
 0x196   : > { %1585 = vst.msk [vmem:[#allocation3 + $0x10] sm:$0xff] %vm911_vm1, %v1581_v19 }
 0x197   : > { %v1976_v22 = vld [vmem:[#allocation2 + $0x10] sm:$0xff] }
 0x19d   : > { %v1980_v21 = vld [vmem:[#allocation3 + $0x10] sm:$0xff] }
 0x19e   : > { %4324 = vmatpush3.xpose.msk.msra.mxu0 %vm911_vm1, %v1980_v21 }
 0x19f   : > { %4333 = vmatprep.subr.mxu0 %v4858_v12 }
 0x1a1   : > { %4326 = vmatmul.mubr.msk.f32.vlgmr.msra.gmra.mrb[14].mxu0 %vm911_vm1, %v1976_v22 }
 0x1a2   : > { %4334 = vmatpush3.msra.mxu0 %v2339_v23  ;;  %4335 = vmatprep.mubr.msk.f32.mxu0 %vm4857_vm0, %v4858_v12 }
 0x1a3   : > { %4343 = vmatprep.subr.mxu0 %v4858_v12 }
 0x1ad   : > { %v1677_v25 = vpop.f32.mrb[8].mxu0 }
 0x1ae   : > { %v1678_v27 = vadd.f32 %v3540_v24, %v1677_v25  ;;  %v4207_v28 = vpop.f32.mrb[9].mxu0 }
 0x1b0   : > { %1682 = vst.msk [vmem:[#allocation4 + $0x10] sm:$0xff] %vm911_vm1, %v1678_v27 }
 0x1b3   : > { %v1774_v29 = vpop.f32.mrb[8].mxu1 }
 0x1b4   : > { %v1775_v30 = vadd.f32 %v3558_v26, %v1774_v29  ;;  %v4242_v31 = vpop.f32.mrb[9].mxu1 }
 0x1b6   : > { %1779 = vst.msk [vmem:[#allocation2 + $0x18] sm:$0xff] %vm911_vm1, %v1775_v30 }
 0x1b7   : > { %v2341_v23 = vld [vmem:[#allocation4 + $0x10] sm:$0xff] }
 0x1bd   : > { %v1977_v41 = vld [vmem:[#allocation2 + $0x18] sm:$0xff] }
 0x1cd   : > { %v1871_v33 = vpop.f32.mrb[10].mxu0 }
 0x1ce   : > { %v1872_v35 = vadd.f32 %v3576_v32, %v1871_v33  ;;  %v4277_v36 = vpop.f32.mrb[11].mxu0  ;;  %v2641_v33 = vld [vmem:[%s5009_s18] sm:$0xff] }
 0x1d0   : > { %1876 = vst.msk [vmem:[#allocation3 + $0x18] sm:$0xff] %vm911_vm1, %v1872_v35 }
 0x1d3   : > { %v1968_v37 = vpop.f32.mrb[10].mxu1 }
 0x1d4   : > { %v1969_v38 = vadd.f32 %v3594_v34, %v1968_v37  ;;  %v4312_v39 = vpop.f32.mrb[11].mxu1  ;;  %v3609_v37 = vld [vmem:[%s5009_s18 + $0x8] sm:$0xff] }
 0x1d6   : > { %1973 = vst.msk [vmem:[#allocation4 + $0x18] sm:$0xff] %vm911_vm1, %v1969_v38 }
 0x1d7   : > { %v1981_v40 = vld [vmem:[#allocation3 + $0x18] sm:$0xff] }
 0x1d8   : > { %4329 = vmatpush3.xpose.msk.msra.mxu1 %vm911_vm1, %v1981_v40  ;;  %v3611_v40 = vld [vmem:[%s5009_s18 + $0x10] sm:$0xff] }
 0x1d9   : > { %4338 = vmatprep.subr.mxu1 %v4858_v12 }
 0x1db   : > { %4331 = vmatmul.mubr.msk.f32.vlgmr.msra.gmra.mrb[14].mxu1 %vm911_vm1, %v1977_v41 }
 0x1dc   : > { %4339 = vmatpush3.msra.mxu1 %v2340_v42  ;;  %4340 = vmatprep.mubr.msk.f32.mxu1 %vm4857_vm0, %v4858_v12 }
 0x1dd   : > { %4348 = vmatprep.subr.mxu1 %v4858_v12  ;;  %v2342_v29 = vld [vmem:[#allocation4 + $0x18] sm:$0xff] }
 0x214   : > { %v2054_v43 = vpop.f32.mrb[12].mxu0 }
 0x215   : > { %v2286_v45 = vmul.f32 0.35355338, %v2054_v43  ;;  %v4317_v46 = vpop.f32.mrb[13].mxu0 }
 0x217   : > { %v2291_v47 = vadd.f32 %v2290_v44, %v2286_v45 }
 0x219   : > { %v2295_v48 = vsel %vm911_vm1, %v2291_v47, -inf }
 0x21a   : > { %2296 = vmax.xlane.f32.xlu0 %v2295_v48 }
 0x24e   : > { %v2130_v49 = vpop.f32.mrb[12].mxu1 }
 0x24f   : > { %v2287_v50 = vmul.f32 0.35355338, %v2130_v49  ;;  %v4322_v51 = vpop.f32.mrb[13].mxu1 }
 0x251   : > { %v2292_v52 = vadd.f32 %v2290_v44, %v2287_v50 }
 0x253   : > { %v2298_v53 = vsel %vm911_vm1, %v2292_v52, -inf }
 0x254   : > { %2299 = vmax.xlane.f32.xlu0 %v2298_v53 }
 0x274   : > { %v2206_v54 = vpop.f32.mrb[14].mxu0 }
 0x275   : > { %v2288_v56 = vmul.f32 0.35355338, %v2206_v54  ;;  %v4327_v55 = vpop.f32.mrb[15].mxu0  ;;  %v2987_v54 = vld [vmem:[%s5023_s3] sm:$0xff] }
 0x276   : > { %v2989_v55 = vld [vmem:[%s5023_s3 + $0x10] sm:$0xff] }
 0x277   : > { %v2293_v57 = vadd.f32 %v2290_v44, %v2288_v56  ;;  %v2988_v56 = vld [vmem:[%s5023_s3 + $0x8] sm:$0xff] }
 0x279   : > { %v2301_v58 = vsel %vm911_vm1, %v2293_v57, -inf }
 0x27a   : > { %2302 = vmax.xlane.f32.xlu1 %v2301_v58  ;;  %v2990_v58 = vld [vmem:[%s5023_s3 + $0x18] sm:$0xff] }
 0x2a7   : > { %v2297_v59 = vpop.xlane.xlu0 %2296 }
 0x2a8   : > { %v2307_v60 = vsub.f32 %v2291_v47, %v2297_v59  ;;  %v4735_v59 = vpack.c.bf16 %v2990_v58, %v2989_v55 }
 0x2aa   : > { %v2311_v61 = vmul.f32 1.442695, %v2307_v60  ;;  %v3608_v60 = vld [vmem:[%s5646_s5] ss:$0 sm:$0xff] }
 0x2ac   : > { %4797 = vpow2.f32 %v2311_v61 }
 0x2ae   : > { %v2282_v62 = vpop.f32.mrb[14].mxu1 }
 0x2af   : > { %v2289_v63 = vmul.f32 0.35355338, %v2282_v62  ;;  %v4332_v0 = vpop.f32.mrb[15].mxu1 }
 0x2b1   : > { %v2294_v2 = vadd.f32 %v2290_v44, %v2289_v63  ;;  %v3613_v44 = vld [vmem:[%s5009_s18 + $0x18] sm:$0xff]  ;;  %s4818_s18 = scalar_lea.vmem %s3213_s22, 128 }
 0x2b2   : > { %p4819_p6 = scmp.ne.s32.totalorder %s3213_s22, %s4818_s18  ;;  %p4826_p10 = scmp.lt.s32.totalorder %s4818_s18, %s4818_s18 }
 0x2b3   : > { %v2304_v5 = vsel %vm911_vm1, %v2294_v2, -inf }
 0x2b4   : > { %2305 = vmax.xlane.f32.xlu1 %v2304_v5  ;;  %p4827_p11 = por %p4826_p10, %p4825_p9 }
 0x2b6   : > { %v4798_v1 = vpop.eup %4797 }
 0x2b7   : > { %v2319_v3 = vsel %vm911_vm1, %v4798_v1, 0.0 }
 0x2b8   : > { %2320 = vadd.xlane.f32.xlu0 %v2319_v3 }
 0x2e1   : > { %v2300_v6 = vpop.xlane.xlu0 %2299 }
 0x2e2   : > { %v2308_v7 = vsub.f32 %v2292_v52, %v2300_v6 }
 0x2e4   : > { %v2313_v8 = vmul.f32 1.442695, %v2308_v7  ;;  %v4817_v7 = vld [vmem:[#allocation6] sm:$0xff] }
 0x2e6   : > { %4799 = vpow2.f32 %v2313_v8 }
 0x2f0   : > { %v4800_v9 = vpop.eup %4799 }
 0x2f1   : > { %v2322_v10 = vsel %vm911_vm1, %v4800_v9, 0.0 }
 0x2f2   : > { %2323 = vadd.xlane.f32.xlu1 %v2322_v10  ;;  %v2991_v10 = vld [vmem:[%s5023_s3 + $0x20] sm:$0xff] }
 0x307   : > { %v2303_v11 = vpop.xlane.xlu1 %2302 }
 0x308   : > { %v2309_v13 = vsub.f32 %v2293_v57, %v2303_v11  ;;  %v4732_v57 = vpack.c.bf16 %v2988_v56, %v2987_v54  ;;  %v2992_v11 = vld [vmem:[%s5023_s3 + $0x28] sm:$0xff] }
 0x30a   : > { %v2315_v14 = vmul.f32 1.442695, %v2309_v13  ;;  %v4738_v13 = vpack.c.bf16 %v2992_v11, %v2991_v10 }
 0x30c   : > { %4801 = vpow2.f32 %v2315_v14  ;;  %v2993_v14 = vld [vmem:[%s5023_s3 + $0x30] sm:$0xff] }
 0x316   : > { %v4802_v15 = vpop.eup %4801 }
 0x317   : > { %v2325_v16 = vsel %vm911_vm1, %v4802_v15, 0.0 }
 0x318   : > { %2326 = vadd.xlane.f32.xlu0 %v2325_v16 }
 0x341   : > { %v2306_v18 = vpop.xlane.xlu1 %2305 }
 0x342   : > { %v2310_v19 = vsub.f32 %v2294_v2, %v2306_v18  ;;  %v2996_v18 = vld [vmem:[%s5023_s3 + $0x48] sm:$0xff] }
 0x344   : > { %v2317_v20 = vmul.f32 1.442695, %v2310_v19 }
 0x345   : > { %v2321_v17 = vpop.xlane.xlu0 %2320 }
 0x346   : > { %4803 = vrcp.f32 %v2321_v17  ;;  %v2995_v17 = vld [vmem:[%s5023_s3 + $0x40] sm:$0xff] }
 0x347   : > { %4805 = vpow2.f32 %v2317_v20  ;;  %v4744_v19 = vpack.c.bf16 %v2996_v18, %v2995_v17  ;;  %v2997_v20 = vld [vmem:[%s5023_s3 + $0x50] sm:$0xff] }
 0x350   : > { %v4804_v21 = vpop.eup %4803 }
 0x351   : > { %v2335_v22 = vmul.f32 %v4804_v21, %v4798_v1  ;;  %v4806_v24 = vpop.eup %4805  ;;  %v2998_v21 = vld [vmem:[%s5023_s3 + $0x58] sm:$0xff] }
 0x352   : > { %v2328_v25 = vsel %vm911_vm1, %v4806_v24, 0.0 }
 0x353   : > { %4336 = vmatmul.mubr.msk.f32.vlgmr.msra.gmra.mrb[16].mxu0 %vm911_vm1, %v2335_v22  ;;  %2329 = vadd.xlane.f32.xlu1 %v2328_v25  ;;  %v4747_v22 = vpack.c.bf16 %v2998_v21, %v2997_v20 }
 0x354   : > { %4344 = vmatpush3.msra.mxu0 %v2341_v23  ;;  %4345 = vmatprep.mubr.msk.f32.mxu0 %vm4857_vm0, %v4858_v12  ;;  %v2999_v23 = vld [vmem:[%s5023_s3 + $0x60] sm:$0xff] }
 0x355   : > { %4353 = vmatprep.subr.mxu0 %v4858_v12 }
 0x37f   : > { %v2324_v26 = vpop.xlane.xlu1 %2323 }
 0x380   : > { %4807 = vrcp.f32 %v2324_v26  ;;  %v3001_v26 = vld [vmem:[%s5023_s3 + $0x70] sm:$0xff] }
 0x38a   : > { %v4808_v27 = vpop.eup %4807 }
 0x38b   : > { %v2336_v28 = vmul.f32 %v4808_v27, %v4800_v9  ;;  %v3002_v27 = vld [vmem:[%s5023_s3 + $0x78] sm:$0xff] }
 0x38d   : > { %4341 = vmatmul.mubr.msk.f32.vlgmr.msra.gmra.mrb[16].mxu1 %vm911_vm1, %v2336_v28  ;;  %v4753_v28 = vpack.c.bf16 %v3002_v27, %v3001_v26 }
 0x38e   : > { %4349 = vmatpush3.msra.mxu1 %v2342_v29  ;;  %4350 = vmatprep.mubr.msk.f32.mxu1 %vm4857_vm0, %v4858_v12  ;;  %v3081_v29 = vld [vmem:[%s5032_s30] sm:$0xff] }
 0x38f   : > { %4358 = vmatprep.subr.mxu1 %v4858_v12 }
 0x3a5   : > { %v2327_v30 = vpop.xlane.xlu0 %2326 }
 0x3a6   : > { %4809 = vrcp.f32 %v2327_v30  ;;  %v3082_v30 = vld [vmem:[%s5032_s30 + $0x8] sm:$0xff] }
 0x3b0   : > { %v4810_v31 = vpop.eup %4809 }
 0x3b1   : > { %v2337_v32 = vmul.f32 %v4810_v31, %v4802_v15  ;;  %v2994_v15 = vld [vmem:[%s5023_s3 + $0x38] sm:$0xff]  ;;  %v3083_v31 = vld [vmem:[%s5032_s30 + $0x10] sm:$0xff] }
 0x3b2   : > { %v4741_v16 = vpack.c.bf16 %v2994_v15, %v2993_v14 }
 0x3b3   : > { %4346 = vmatmul.mubr.msk.f32.vlgmr.msra.gmra.mrb[18].mxu0 %vm911_vm1, %v2337_v32  ;;  %v4756_v32 = vpack.c.bf16 %v3082_v30, %v3081_v29 }
 0x3b4   : > { %4354 = vmatpush3.msra.mxu0 %v2641_v33  ;;  %4355 = vmatprep.mubr.msk.f32.mxu0 %vm4857_vm0, %v4858_v12  ;;  %v3084_v33 = vld [vmem:[%s5032_s30 + $0x18] sm:$0xff] }
 0x3b5   : > { %4363 = vmatprep.subr.mxu0 %v4858_v12 }
 0x3e0   : > { %v2330_v34 = vpop.xlane.xlu1 %2329 }
 0x3e1   : > { %4811 = vrcp.f32 %v2330_v34  ;;  %v4759_v34 = vpack.c.bf16 %v3084_v33, %v3083_v31 }
 0x3eb   : > { %v4812_v35 = vpop.eup %4811 }
 0x3ec   : > { %v2338_v36 = vmul.f32 %v4812_v35, %v4806_v24  ;;  %v3000_v24 = vld [vmem:[%s5023_s3 + $0x68] sm:$0xff]  ;;  %v3085_v35 = vld [vmem:[%s5032_s30 + $0x20] sm:$0xff] }
 0x3ed   : > { %v4750_v25 = vpack.c.bf16 %v3000_v24, %v2999_v23  ;;  %v3619_v23 = vld [vmem:[%s807_s19] ss:$0 sm:$0xff] }
 0x3ee   : > { %4351 = vmatmul.mubr.msk.f32.vlgmr.msra.gmra.mrb[18].mxu1 %vm911_vm1, %v2338_v36  ;;  %v3086_v36 = vld [vmem:[%s5032_s30 + $0x28] sm:$0xff] }
 0x3ef   : > { %4359 = vmatpush3.msra.mxu1 %v3609_v37  ;;  %4360 = vmatprep.mubr.msk.f32.mxu1 %vm4857_vm0, %v4858_v12  ;;  %v4762_v37 = vpack.c.bf16 %v3086_v36, %v3085_v35 }
 0x3f0   : > { %4368 = vmatprep.subr.mxu1 %v4858_v12 }
 0x426   : > { %v2412_v38 = vpop.f32.mrb[16].mxu0 }
 0x427   : > { %2635 = vst.msk [vmem:[#allocation5] sm:$0xff] %vm911_vm1, %v2412_v38  ;;  %v4337_v39 = vpop.f32.mrb[17].mxu0  ;;  %v3087_v38 = vld [vmem:[%s5032_s30 + $0x30] sm:$0xff] }
 0x428   : > { %v3088_v39 = vld [vmem:[%s5032_s30 + $0x38] sm:$0xff] }
 0x42e   : > { %v2640_v41 = vld [vmem:[#allocation5] sm:$0xff] }
 0x42f   : > { %4356 = vmatmul.mubr.msk.f32.vlgmr.msra.gmra.mrb[20].mxu0 %vm911_vm1, %v2640_v41  ;;  %v3089_v41 = vld [vmem:[%s5032_s30 + $0x40] sm:$0xff] }
 0x430   : > { %4364 = vmatpush3.msra.mxu0 %v3611_v40  ;;  %4365 = vmatprep.mubr.msk.f32.mxu0 %vm4857_vm0, %v4858_v12  ;;  %v4765_v40 = vpack.c.bf16 %v3088_v39, %v3087_v38 }
 0x431   : > { %4731 = vmatprep.subr.bf16.mxu0 %v4856_v4 }
 0x460   : > { %v2485_v42 = vpop.f32.mrb[16].mxu1 }
 0x461   : > { %2636 = vst.msk [vmem:[#allocation5 + $0x8] sm:$0xff] %vm911_vm1, %v2485_v42  ;;  %v4342_v43 = vpop.f32.mrb[17].mxu1  ;;  %v3090_v42 = vld [vmem:[%s5032_s30 + $0x48] sm:$0xff] }
 0x462   : > { %v4768_v43 = vpack.c.bf16 %v3090_v42, %v3089_v41 }
 0x468   : > { %v2723_v45 = vld [vmem:[#allocation5 + $0x8] sm:$0xff] }
 0x469   : > { %4361 = vmatmul.mubr.msk.f32.vlgmr.msra.gmra.mrb[20].mxu1 %vm911_vm1, %v2723_v45  ;;  %v3092_v45 = vld [vmem:[%s5032_s30 + $0x58] sm:$0xff] }
 0x46a   : > { %4369 = vmatpush3.msra.mxu1 %v3613_v44  ;;  %4370 = vmatprep.mubr.msk.f32.mxu1 %vm4857_vm0, %v4858_v12  ;;  %v3091_v44 = vld [vmem:[%s5032_s30 + $0x50] sm:$0xff] }
 0x46b   : > { %4755 = vmatprep.subr.bf16.mxu1 %v4856_v4 }
 0x486   : > { %v2558_v46 = vpop.f32.mrb[18].mxu0 }
 0x487   : > { %2637 = vst.msk [vmem:[#allocation5 + $0x10] sm:$0xff] %vm911_vm1, %v2558_v46  ;;  %v4347_v47 = vpop.f32.mrb[19].mxu0  ;;  %v4771_v46 = vpack.c.bf16 %v3092_v45, %v3091_v44 }
 0x488   : > { %v3093_v47 = vld [vmem:[%s5032_s30 + $0x60] sm:$0xff] }
 0x48e   : > { %v2801_v48 = vld [vmem:[#allocation5 + $0x10] sm:$0xff] }
 0x48f   : > { %4366 = vmatmul.mubr.msk.f32.vlgmr.msra.gmra.mrb[22].mxu0 %vm911_vm1, %v2801_v48  ;;  %v3094_v48 = vld [vmem:[%s5032_s30 + $0x68] sm:$0xff] }
 0x490   : > { %4405 = vmatprep.mubr.msk.f32.mxu0 %vm4857_vm0, %v4858_v12  ;;  %4733 = vmatpush3.bf16.msra.mxu0 %v4732_v57 }
 0x491   : > { %4734 = vmatprep.subr.bf16.mxu0 %v4856_v4 }
 0x494   : > { %4736 = vmatpush3.bf16.msra.mxu0 %v4735_v59  ;;  %v3615_v59 = vld [vmem:[%s5647_s1] ss:$0 sm:$0xff] }
 0x495   : > { %4737 = vmatprep.subr.bf16.mxu0 %v4856_v4 }
 0x498   : > { %4739 = vmatpush3.bf16.msra.mxu0 %v4738_v13 }
 0x499   : > { %4740 = vmatprep.subr.bf16.mxu0 %v4856_v4 }
 0x49c   : > { %4742 = vmatpush3.bf16.msra.mxu0 %v4741_v16 }
 0x49d   : > { %4743 = vmatprep.subr.bf16.mxu0 %v4856_v4 }
 0x4a0   : > { %4745 = vmatpush3.bf16.msra.mxu0 %v4744_v19 }
 0x4a1   : > { %4746 = vmatprep.subr.bf16.mxu0 %v4856_v4 }
 0x4a4   : > { %4748 = vmatpush3.bf16.msra.mxu0 %v4747_v22 }
 0x4a5   : > { %4749 = vmatprep.subr.bf16.mxu0 %v4856_v4 }
 0x4a8   : > { %4751 = vmatpush3.bf16.msra.mxu0 %v4750_v25  ;;  %v3620_v25 = vld [vmem:[%s810_s8] ss:$0 sm:$0xff] }
 0x4a9   : > { %4752 = vmatprep.subr.bf16.mxu0 %v4856_v4 }
 0x4ac   : > { %4754 = vmatpush3.bf16.msra.mxu0 %v4753_v28 }
 0x4c1   : > { %v2631_v49 = vpop.f32.mrb[18].mxu1 }
 0x4c2   : > { %2638 = vst.msk [vmem:[#allocation5 + $0x18] sm:$0xff] %vm911_vm1, %v2631_v49  ;;  %v4352_v50 = vpop.f32.mrb[19].mxu1  ;;  %v4774_v49 = vpack.c.bf16 %v3094_v48, %v3093_v47 }
 0x4c9   : > { %v2879_v51 = vld [vmem:[#allocation5 + $0x18] sm:$0xff] }
 0x4ca   : > { %4371 = vmatmul.mubr.msk.f32.vlgmr.msra.gmra.mrb[22].mxu1 %vm911_vm1, %v2879_v51 }
 0x4cb   : > { %4440 = vmatprep.mubr.msk.f32.mxu1 %vm4857_vm0, %v4858_v12  ;;  %4757 = vmatpush3.bf16.msra.mxu1 %v4756_v32 }
 0x4cc   : > { %4758 = vmatprep.subr.bf16.mxu1 %v4856_v4 }
 0x4cf   : > { %4760 = vmatpush3.bf16.msra.mxu1 %v4759_v34 }
 0x4d0   : > { %4761 = vmatprep.subr.bf16.mxu1 %v4856_v4 }
 0x4d3   : > { %4763 = vmatpush3.bf16.msra.mxu1 %v4762_v37 }
 0x4d4   : > { %4764 = vmatprep.subr.bf16.mxu1 %v4856_v4 }
 0x4d7   : > { %4766 = vmatpush3.bf16.msra.mxu1 %v4765_v40 }
 0x4d8   : > { %4767 = vmatprep.subr.bf16.mxu1 %v4856_v4 }
 0x4db   : > { %4769 = vmatpush3.bf16.msra.mxu1 %v4768_v43 }
 0x4dc   : > { %4770 = vmatprep.subr.bf16.mxu1 %v4856_v4 }
 0x4df   : > { %4772 = vmatpush3.bf16.msra.mxu1 %v4771_v46 }
 0x4e0   : > { %4773 = vmatprep.subr.bf16.mxu1 %v4856_v4 }
 0x4e3   : > { %4775 = vmatpush3.bf16.msra.mxu1 %v4774_v49 }
 0x4e4   : > { %4776 = vmatprep.subr.bf16.mxu1 %v4856_v4 }
 0x502   : > { %v2711_v52 = vpop.f32.mrb[20].mxu0 }
 0x503   : > { %v4357_v53 = vpop.f32.mrb[21].mxu0  ;;  %v2721_v12 = vadd.f32 %v3608_v60, %v2711_v52  ;;  %v3616_v60 = vld [vmem:[%s5648_s24] ss:$0 sm:$0xff] }
 0x53c   : > { %v2795_v61 = vpop.f32.mrb[20].mxu1 }
 0x53d   : > { %v2799_v62 = vadd.f32 %v2795_v61, %v2721_v12  ;;  %v4362_v63 = vpop.f32.mrb[21].mxu1 }
 0x53e   : > { %v3096_v63 = vld [vmem:[%s5032_s30 + $0x78] sm:$0xff] }
 0x562   : > { %v2873_v0 = vpop.f32.mrb[22].mxu0 }
 0x563   : > { %v2877_v1 = vadd.f32 %v2873_v0, %v2799_v62  ;;  %v4367_v2 = vpop.f32.mrb[23].mxu0  ;;  %v3095_v62 = vld [vmem:[%s5032_s30 + $0x70] sm:$0xff]  ;;  %s5649_s30 = sld [smem:[#allocation10_spill]] }
 0x564   : > { %v4777_v0 = vpack.c.bf16 %v3096_v63, %v3095_v62 }
 0x566   : > { %4778 = vmatpush3.bf16.msra.mxu1 %v4777_v0 }
 0x569   : > { %p4783_p5 = scmp.eq.s32.totalorder %s5649_s30, 1 }
 0x56b   : > { %p4820_p7 = pnand %p4819_p6, %p4783_p5 }
 0x56d   : > { %p4821_p8 = pneg %p4820_p7 }
 0x56f   : > { %p4828_p12 = pnand %p4827_p11, %p4821_p8 }
 0x59d   : > { %v2951_v3 = vpop.f32.mrb[22].mxu1 }
 0x59e   : > { %v2955_v5 = vadd.f32 %v2951_v3, %v2877_v1  ;;  %v4372_v6 = vpop.f32.mrb[23].mxu1  ;;  %v3617_v1 = vld [vmem:[%s796_s4] ss:$0 sm:$0xff] }
 0x5a0   : > { %v5488_v8 = vadd.f32 %v4817_v7, %v2955_v5  ;;  %v3618_v7 = vld [vmem:[%s804_s6] ss:$0 sm:$0xff] }
 0x5a2   : > { %2957 = vadd.xlane.f32.xlu0 %v5488_v8  ;;  %v2961_v9 = vmul.f32 %v5488_v8, %v5488_v8 }
 0x5a4   : > { %2962 = vadd.xlane.f32.xlu1 %v2961_v9 }
 0x62f   : > { %v2958_v50 = vpop.xlane.xlu0 %2957 }
 0x630   : > { %v2960_v51 = vmul.f32 0.03125, %v2958_v50 }
 0x631   : > { %v2963_v52 = vpop.xlane.xlu1 %2962 }
 0x632   : > { %v2965_v53 = vmul.f32 %v2960_v51, %v2960_v51  ;;  %v2964_v54 = vmul.f32 0.03125, %v2963_v52  ;;  %v2967_v57 = vsub.f32 %v5488_v8, %v2960_v51 }
 0x634   : > { %v2966_v56 = vsub.f32 %v2964_v54, %v2965_v53 }
 0x636   : > { %v2968_v55 = vadd.f32 1e-05, %v2966_v56 }
 0x638   : > { %4813 = vrsqrt.f32 %v2968_v55 }
 0x642   : > { %v4814_v58 = vpop.eup %4813 }
 0x643   : > { %v2970_v4 = vmul.f32 %v4814_v58, %v2967_v57 }
 0x645   : > { %v2978_v12 = vmul.f32 %v3615_v59, %v2970_v4 }
 0x647   : > { %v2986_v61 = vadd.f32 %v3616_v60, %v2978_v12 }
 0x649   : > { %4406 = vmatmul.mubr.f32.vlgmr.msra.gmra.mrb[24].mxu0 %v2986_v61 }
 0x71c   : > { %v3076_v2 = vpop.f32.mrb[24].mxu0 }
 0x71d   : > { %v3077_v3 = vadd.f32 %v3617_v1, %v3076_v2  ;;  %v4407_v5 = vpop.f32.mrb[25].mxu0 }
 0x71f   : > { %v3080_v6 = vmax.f32 %v3077_v3, 0.0 }
 0x721   : > { %4441 = vmatmul.mubr.f32.vlgmr.msra.gmra.mrb[24].mxu1 %v3080_v6 }
 0x7f4   : > { %v3170_v8 = vpop.f32.mrb[24].mxu1 }
 0x7f5   : > { %v3171_v9 = vadd.f32 %v3618_v7, %v3170_v8  ;;  %v4442_v10 = vpop.f32.mrb[25].mxu1 }
 0x7f7   : > { %v3174_v11 = vadd.f32 %v3171_v9, %v2986_v61 }
 0x7f9   : > { %3175 = vadd.xlane.f32.xlu0 %v3174_v11  ;;  %v3178_v13 = vmul.f32 %v3174_v11, %v3174_v11 }
 0x7fb   : > { %3179 = vadd.xlane.f32.xlu1 %v3178_v13 }
 0x886   : > { %v3176_v14 = vpop.xlane.xlu0 %3175 }
 0x887   : > { %v3177_v15 = vmul.f32 0.03125, %v3176_v14 }
 0x888   : > { %v3180_v16 = vpop.xlane.xlu1 %3179 }
 0x889   : > { %v3182_v17 = vmul.f32 %v3177_v15, %v3177_v15  ;;  %v3181_v18 = vmul.f32 0.03125, %v3180_v16  ;;  %v3184_v21 = vsub.f32 %v3174_v11, %v3177_v15 }
 0x88b   : > { %v3183_v19 = vsub.f32 %v3181_v18, %v3182_v17 }
 0x88d   : > { %v3185_v20 = vadd.f32 1e-05, %v3183_v19 }
 0x88f   : > { %4815 = vrsqrt.f32 %v3185_v20 }
 0x899   : > { %v4816_v22 = vpop.eup %4815 }
 0x89a   : > { %v3187_v24 = vmul.f32 %v4816_v22, %v3184_v21 }
 0x89c   : > { %v3195_v26 = vmul.f32 %v3619_v23, %v3187_v24 }
 0x89e   : > { %v3203_v27 = vadd.f32 %v3620_v25, %v3195_v26 }
 0x8a0   : > { %3204 = vst [vmem:[#allocation6] sm:$0xff] %v3203_v27 }
 0x8a1   : > { %4831 = shalt.err (!%p4828_p12)
}
 0x8a2   : > { %s5650_s8 = sld [smem:[#allocation24_spill]] }
 0x8a8   : > { %s4832_s26 = scalar_lea.hbm %s5650_s8, 128 }
 0x8a9   : > { %p4833_p13 = scmp.ne.s32.totalorder %s5650_s8, %s4832_s26  ;;  %p4838_p2 = scmp.lt.u32.totalorder %s4832_s26, %s5650_s8 }
 0x8ab   : > { %p4834_p0 = pnand %p4833_p13, %p4783_p5 }
 0x8ad   : > { %p4835_p1 = pneg %p4834_p0 }
 0x8af   : > { %p4840_p3 = pnand %p4838_p2, %p4835_p1 }
 0x8b1   : > { %4843 = shalt.err (!%p4840_p3)
}
 0x8b2   : > { %4780 = dma.vmem_to_hbm [thread:$0]  (%p4783_p5), %s3213_s22, 128, %s5650_s8, [#allocation7]  }
 0x8b3   : > { %4849 = dma.done.wait (%p4783_p5), [#allocation7], 128  }
 0x8b4   : > { %4851 = vsyncadd (%p4783_p5), [#allocation7], 4294967168 }
 0x8b5 PF: > { %s5651_s24 = sld [smem:[#allocation9_spill]] }
 0x8bb   : > { %s29_s27 = sadd.s32 1, %s5651_s24  }
 0x8bc   : > { %p26_p4 = scmp.ge.s32.totalorder %s29_s27, 4  }
 0x8be   :  { %28 = sbr.rel (!%p26_p4) target bundleno = 13 (0xd), region = 201 }
 0x8c5   :  { %3225 = vsyncpa [#allocation7], 1 }
 0x8c6   :  { %3227 = vsyncpa [#allocation7 + $0x1], 1 }

</bundles_post_ra>
